<compile_context>
chip_gen: v7x
topology: tpu7x:2x2x1
jax: 0.10.0
libtpu: 0.0.40
codegen_flags: <defaults>
</compile_context>

<pallas_src>
import math

import jax
import jax.numpy as jnp
from jax.experimental import pallas as pl
from jax.experimental.pallas import tpu as pltpu

# ---------------- config ----------------
HIDDEN = 32
NUM_HEADS = 2
HEAD_DIM = HIDDEN // NUM_HEADS
INTERMEDIATE = 64
NUM_LAYERS = 2
VOCAB = 100
MAX_POS = 64
TYPE_VOCAB = 2
NUM_LABELS = 3
LN_EPS = 1e-12

# packing constants
VOCAB_PAD = 128                       # word-emb rows padded to one full lane tile
HEAD_PAD = 128                        # classifier output lanes padded (lane-dense store)
_R_WQKV = 0                           # rows  0:32   lanes 0:96   fused QKV weight
_R_WO = HIDDEN                        # rows 32:64   lanes 0:32   attention output proj
_R_W1 = 2 * HIDDEN                    # rows 64:96   lanes 0:64   FFN w1
_R_W2 = 3 * HIDDEN                    # rows 96:160  lanes 0:32   FFN w2
_R_VEC = 3 * HIDDEN + INTERMEDIATE    # rows 160:168 all per-layer bias / LN vectors
LYR_ROWS = _R_VEC + 8                 # 168 (multiple of 8)
LYR_LANES = 128


# ---------------- fused Pallas kernel ----------------
def _fused_bert_kernel(ids_ref, mask_ref, emb_ref, lyr_ref, head_ref, o_ref):
    B, S = mask_ref.shape
    H, I = HIDDEN, INTERMEDIATE
    dh = H // NUM_HEADS
    scale = 1.0 / math.sqrt(dh)

    def ln(x, g, b):
        mu = jnp.mean(x, axis=-1, keepdims=True)
        var = jnp.mean((x - mu) ** 2, axis=-1, keepdims=True)
        return (x - mu) * jax.lax.rsqrt(var + LN_EPS) * g + b

    def gelu(x):
        # TODO(synk): tanh-approx GELU; HF BERT default is exact erf-GELU.
        c = jnp.float32(0.7978845608028654)  # sqrt(2/pi)
        return 0.5 * x * (1.0 + jnp.tanh(c * (x + 0.044715 * x * x * x)))

    # ---- embeddings: one-hot gather through the MXU (fused in-kernel) ----
    ids = ids_ref[...]                                                    # (B*S, 1) int32
    vocab_iota = jax.lax.broadcasted_iota(jnp.int32, (B * S, VOCAB_PAD), 1)
    onehot = (vocab_iota == ids).astype(jnp.float32)                      # (B*S, 128)
    x = jnp.dot(onehot, emb_ref[0:VOCAB_PAD, :],
                preferred_element_type=jnp.float32)                       # (B*S, H)
    pos_type = emb_ref[VOCAB_PAD:VOCAB_PAD + S, :]                        # (S, H)
    x = x + jnp.concatenate([pos_type] * B, axis=0)                       # (B*S, H)
    eg_eb = emb_ref[VOCAB_PAD + S:VOCAB_PAD + S + 2, :]                   # (2, H)
    x = ln(x, eg_eb[0:1, :], eg_eb[1:2, :])

    # ---- HF-style additive attention mask, built in-kernel ----
    amask = (1.0 - mask_ref[...].astype(jnp.float32)) * jnp.finfo(jnp.float32).min  # (B,S)

    for l in range(NUM_LAYERS):                                           # static unroll
        wqkv = lyr_ref[l, _R_WQKV:_R_WQKV + H, 0:3 * H]                   # (H, 3H)
        wo = lyr_ref[l, _R_WO:_R_WO + H, 0:H]                             # (H, H)
        w1 = lyr_ref[l, _R_W1:_R_W1 + H, 0:I]                             # (H, I)
        w2 = lyr_ref[l, _R_W2:_R_W2 + I, 0:H]                             # (I, H)
        vecs = lyr_ref[l, _R_VEC:_R_VEC + 8, :]                           # (8, 128) aligned
        bqkv = vecs[0:1, 0:3 * H]
        bo = vecs[1:2, 0:H]
        ln1_g, ln1_b = vecs[2:3, 0:H], vecs[3:4, 0:H]
        b1 = vecs[4:5, 0:I]
        b2 = vecs[5:6, 0:H]
        ln2_g, ln2_b = vecs[6:7, 0:H], vecs[7:8, 0:H]

        # fused QKV projection over the whole folded batch
        qkv = jnp.dot(x, wqkv, preferred_element_type=jnp.float32) + bqkv  # (B*S, 3H)

        # per-(batch, head) attention; accumulate directly through W_o (no head concat)
        attn_rows = []
        for b in range(B):
            r0 = b * S
            am = amask[b:b + 1, :]                                         # (1, S)
            acc = None
            for hh in range(NUM_HEADS):
                q = qkv[r0:r0 + S, hh * dh:(hh + 1) * dh]                  # (S, dh)
                k = qkv[r0:r0 + S, H + hh * dh:H + (hh + 1) * dh]          # (S, dh)
                v = qkv[r0:r0 + S, 2 * H + hh * dh:2 * H + (hh + 1) * dh]  # (S, dh)
                s = jax.lax.dot_general(
                    q, k, (((1,), (1,)), ((), ())),
                    preferred_element_type=jnp.float32) * scale            # (S, S)
                s = s + am
                s = s - jnp.max(s, axis=-1, keepdims=True)
                p = jnp.exp(s)
                p = p / jnp.sum(p, axis=-1, keepdims=True)                 # exact softmax
                ctx = jnp.dot(p, v, preferred_element_type=jnp.float32)    # (S, dh)
                part = jnp.dot(ctx, wo[hh * dh:(hh + 1) * dh, :],
                               preferred_element_type=jnp.float32)         # (S, H)
                acc = part if acc is None else acc + part
            attn_rows.append(acc)
        attn = jnp.concatenate(attn_rows, axis=0) + bo                     # (B*S, H)
        x = ln(attn + x, ln1_g, ln1_b)

        # ---- FFN ----
        y = jnp.dot(x, w1, preferred_element_type=jnp.float32) + b1        # (B*S, I)
        y = gelu(y)
        z = jnp.dot(y, w2, preferred_element_type=jnp.float32) + b2        # (B*S, H)
        x = ln(z + x, ln2_g, ln2_b)

    # ---- classifier head on CLS rows only; lane-dense padded output ----
    cls_w = head_ref[0:H, :]                                               # (H, 128)
    cls_b = head_ref[H:H + 1, :]                                           # (1, 128)
    x_cls = jnp.concatenate([x[b * S:b * S + 1, :] for b in range(B)], axis=0)  # (B, H)
    o_ref[...] = (jnp.dot(x_cls, cls_w, preferred_element_type=jnp.float32)
                  + cls_b)                                                 # (B, 128)


# ---------------- wrapper ----------------
def bert_forward_fused(input_ids, attention_mask, emb_pack, lyr_pack, head_pack):
    B, S = input_ids.shape
    ids2d = input_ids.reshape(B * S, 1).astype(jnp.int32)
    mask = attention_mask.astype(jnp.int32)
    vmem = pl.BlockSpec(memory_space=pltpu.MemorySpace.VMEM)
    out = pl.pallas_call(
        _fused_bert_kernel,
        out_shape=jax.ShapeDtypeStruct((B, HEAD_PAD), jnp.float32),
        in_specs=[vmem, vmem, vmem, vmem, vmem],
        out_specs=vmem,
        compiler_params=pltpu.CompilerParams(vmem_limit_bytes=16 * 1024 * 1024),
    )(ids2d, mask, emb_pack, lyr_pack, head_pack)
    return out[:, :NUM_LABELS]                                             # (B, NUM_LABELS)


# ---------------- parameter init (deterministic, synthetic) ----------------
def init_params(key):
    keys = iter(jax.random.split(key, 64))

    def w(shape, scale=0.02):
        return scale * jax.random.normal(next(keys), shape, dtype=jnp.float32)

    params = {
        "word_emb": w((VOCAB, HIDDEN)),
        "pos_emb": w((MAX_POS, HIDDEN)),
        "type_emb": w((TYPE_VOCAB, HIDDEN)),
        "emb_ln_g": jnp.ones((HIDDEN,), jnp.float32),
        "emb_ln_b": jnp.zeros((HIDDEN,), jnp.float32),
        "layers": [],
        "cls_w": w((HIDDEN, NUM_LABELS)),
        "cls_b": jnp.zeros((NUM_LABELS,), jnp.float32),
    }
    for _ in range(NUM_LAYERS):
        params["layers"].append(
            {
                "wq": w((HIDDEN, HIDDEN)), "bq": jnp.zeros((HIDDEN,), jnp.float32),
                "wk": w((HIDDEN, HIDDEN)), "bk": jnp.zeros((HIDDEN,), jnp.float32),
                "wv": w((HIDDEN, HIDDEN)), "bv": jnp.zeros((HIDDEN,), jnp.float32),
                "wo": w((HIDDEN, HIDDEN)), "bo": jnp.zeros((HIDDEN,), jnp.float32),
                "ln1_g": jnp.ones((HIDDEN,), jnp.float32),
                "ln1_b": jnp.zeros((HIDDEN,), jnp.float32),
                "w1": w((HIDDEN, INTERMEDIATE)),
                "b1": jnp.zeros((INTERMEDIATE,), jnp.float32),
                "w2": w((INTERMEDIATE, HIDDEN)),
                "b2": jnp.zeros((HIDDEN,), jnp.float32),
                "ln2_g": jnp.ones((HIDDEN,), jnp.float32),
                "ln2_b": jnp.zeros((HIDDEN,), jnp.float32),
            }
        )
    return params


def pack_params(p, S):
    """Pack all weights into 3 tensors (embed / per-layer / head) -> 3 DMAs total."""
    H, I, L = HIDDEN, INTERMEDIATE, NUM_LAYERS

    # Embedding pack: word table (padded to 128 rows), pos+type rows, emb-LN gamma/beta.
    emb_rows = VOCAB_PAD + S + 2
    emb_rows_pad = ((emb_rows + 7) // 8) * 8
    emb = jnp.zeros((emb_rows_pad, H), jnp.float32)
    emb = emb.at[:VOCAB, :].set(p["word_emb"])
    pos_type = p["pos_emb"][:S] + p["type_emb"][0][None, :]
    emb = emb.at[VOCAB_PAD:VOCAB_PAD + S, :].set(pos_type)
    emb = emb.at[VOCAB_PAD + S, :].set(p["emb_ln_g"])
    emb = emb.at[VOCAB_PAD + S + 1, :].set(p["emb_ln_b"])

    # Per-layer pack: all matrices + all bias/LN vectors in one (L, 168, 128) tensor.
    lyr = jnp.zeros((L, LYR_ROWS, LYR_LANES), jnp.float32)
    for l, lp in enumerate(p["layers"]):
        wqkv = jnp.concatenate([lp["wq"], lp["wk"], lp["wv"]], axis=1)    # (H, 3H)
        bqkv = jnp.concatenate([lp["bq"], lp["bk"], lp["bv"]])            # (3H,)
        lyr = lyr.at[l, _R_WQKV:_R_WQKV + H, 0:3 * H].set(wqkv)
        lyr = lyr.at[l, _R_WO:_R_WO + H, 0:H].set(lp["wo"])
        lyr = lyr.at[l, _R_W1:_R_W1 + H, 0:I].set(lp["w1"])
        lyr = lyr.at[l, _R_W2:_R_W2 + I, 0:H].set(lp["w2"])
        lyr = lyr.at[l, _R_VEC + 0, 0:3 * H].set(bqkv)
        lyr = lyr.at[l, _R_VEC + 1, 0:H].set(lp["bo"])
        lyr = lyr.at[l, _R_VEC + 2, 0:H].set(lp["ln1_g"])
        lyr = lyr.at[l, _R_VEC + 3, 0:H].set(lp["ln1_b"])
        lyr = lyr.at[l, _R_VEC + 4, 0:I].set(lp["b1"])
        lyr = lyr.at[l, _R_VEC + 5, 0:H].set(lp["b2"])
        lyr = lyr.at[l, _R_VEC + 6, 0:H].set(lp["ln2_g"])
        lyr = lyr.at[l, _R_VEC + 7, 0:H].set(lp["ln2_b"])

    # Head pack: classifier weight + bias, zero-padded to 128 output lanes.
    head = jnp.zeros((40, HEAD_PAD), jnp.float32)                          # 40 = pad(H+1, 8)
    head = head.at[0:H, 0:NUM_LABELS].set(p["cls_w"])
    head = head.at[H, 0:NUM_LABELS].set(p["cls_b"])
    return emb, lyr, head


# ---------------- model forward ----------------
def multi_label_classifier_forward(params, input_ids, attention_mask):
    _, S = input_ids.shape
    emb_pack, lyr_pack, head_pack = pack_params(params, S)
    # Note: reference module uses outputs[0][:, 0] (last_hidden_state CLS), no pooler.
    return bert_forward_fused(input_ids, attention_mask, emb_pack, lyr_pack, head_pack)


if __name__ == "__main__":
    B, S = 2, 8
    key = jax.random.PRNGKey(0)
    k_param, k_ids = jax.random.split(key)

    params = init_params(k_param)
    input_ids = jax.random.randint(k_ids, (B, S), 0, VOCAB, dtype=jnp.int32)
    attention_mask = jnp.ones((B, S), dtype=jnp.int32).at[1, 6:].set(0)

    logits = multi_label_classifier_forward(params, input_ids, attention_mask)
    logits = jax.block_until_ready(logits)
    assert logits.shape == (B, NUM_LABELS) and logits.dtype == jnp.float32
    print("KERNEL_OK")
</pallas_src>

<mosaic_0001>
module attributes {stable_mosaic.version = 11 : i64} {
  func.func @_fused_bert_kernel(%arg0: memref<16x1xi32, #tpu.memory_space<vmem>>, %arg1: memref<2x8xi32, #tpu.memory_space<vmem>>, %arg2: memref<144x32xf32, #tpu.memory_space<vmem>>, %arg3: memref<2x168x128xf32, #tpu.memory_space<vmem>>, %arg4: memref<40x128xf32, #tpu.memory_space<vmem>>, %arg5: memref<2x128xf32, #tpu.memory_space<vmem>>) attributes {dimension_semantics = [], scalar_prefetch = 0 : i64, scratch_operands = 0 : i64, tpu.core_type = #tpu.core_type<tc>} {
    %c0 = arith.constant 0 : index
    %c0_0 = arith.constant 0 : index
    %0 = vector.load %arg0[%c0, %c0_0] : memref<16x1xi32, #tpu.memory_space<vmem>>, vector<16x1xi32>
    %1 = tpu.iota {dimensions = array<i32: 1>} : vector<16x128xi32>
    %2 = vector.broadcast %0 : vector<16x1xi32> to vector<16x128xi32>
    %3 = arith.cmpi eq, %1, %2 : vector<16x128xi32>
    %4 = arith.extui %3 : vector<16x128xi1> to vector<16x128xi32>
    %5 = arith.sitofp %4 : vector<16x128xi32> to vector<16x128xf32>
    %c0_1 = arith.constant 0 : index
    %c0_2 = arith.constant 0 : index
    %6 = vector.load %arg2[%c0_1, %c0_2] : memref<144x32xf32, #tpu.memory_space<vmem>>, vector<128x32xf32>
    %cst = arith.constant dense<0.000000e+00> : vector<16x32xf32>
    %7 = tpu.matmul %5, %6, %cst {dimension_numbers = #tpu.dot_dimension_numbers<[1], [0], [0], [1], [0, 0, 1, 1], [], []>} : vector<16x128xf32>, vector<128x32xf32>, vector<16x32xf32> -> vector<16x32xf32>
    %c128 = arith.constant 128 : index
    %c0_3 = arith.constant 0 : index
    %8 = vector.load %arg2[%c128, %c0_3] : memref<144x32xf32, #tpu.memory_space<vmem>>, vector<8x32xf32>
    %9 = tpu.concatenate %8, %8 in 0 : vector<8x32xf32>, vector<8x32xf32> -> vector<16x32xf32>
    %10 = arith.addf %7, %9 : vector<16x32xf32>
    %c136 = arith.constant 136 : index
    %c0_4 = arith.constant 0 : index
    %11 = vector.load %arg2[%c136, %c0_4] : memref<144x32xf32, #tpu.memory_space<vmem>>, vector<2x32xf32>
    %12 = vector.extract_strided_slice %11 {offsets = [0, 0], sizes = [1, 32], strides = [1, 1]} : vector<2x32xf32> to vector<1x32xf32>
    %13 = vector.extract_strided_slice %11 {offsets = [1, 0], sizes = [1, 32], strides = [1, 1]} : vector<2x32xf32> to vector<1x32xf32>
    %cst_5 = arith.constant dense<0.000000e+00> : vector<16xf32>
    %14 = vector.multi_reduction <add>, %10, %cst_5 [1] : vector<16x32xf32> to vector<16xf32>
    %15 = vector.shape_cast %14 : vector<16xf32> to vector<16x1xf32>
    %cst_6 = arith.constant 3.200000e+01 : f32
    %16 = vector.broadcast %cst_6 : f32 to vector<16x1xf32>
    %17 = arith.divf %15, %16 : vector<16x1xf32>
    %18 = vector.broadcast %17 : vector<16x1xf32> to vector<16x32xf32>
    %19 = arith.subf %10, %18 : vector<16x32xf32>
    %20 = arith.mulf %19, %19 : vector<16x32xf32>
    %cst_7 = arith.constant dense<0.000000e+00> : vector<16xf32>
    %21 = vector.multi_reduction <add>, %20, %cst_7 [1] : vector<16x32xf32> to vector<16xf32>
    %22 = vector.shape_cast %21 : vector<16xf32> to vector<16x1xf32>
    %cst_8 = arith.constant 3.200000e+01 : f32
    %23 = vector.broadcast %cst_8 : f32 to vector<16x1xf32>
    %24 = arith.divf %22, %23 : vector<16x1xf32>
    %25 = vector.broadcast %17 : vector<16x1xf32> to vector<16x32xf32>
    %26 = arith.subf %10, %25 : vector<16x32xf32>
    %cst_9 = arith.constant 9.99999996E-13 : f32
    %27 = vector.broadcast %cst_9 : f32 to vector<16x1xf32>
    %28 = arith.addf %24, %27 : vector<16x1xf32>
    %29 = math.rsqrt %28 : vector<16x1xf32>
    %30 = vector.broadcast %29 : vector<16x1xf32> to vector<16x32xf32>
    %31 = arith.mulf %26, %30 : vector<16x32xf32>
    %32 = vector.broadcast %12 : vector<1x32xf32> to vector<16x32xf32>
    %33 = arith.mulf %31, %32 : vector<16x32xf32>
    %34 = vector.broadcast %13 : vector<1x32xf32> to vector<16x32xf32>
    %35 = arith.addf %33, %34 : vector<16x32xf32>
    %c0_10 = arith.constant 0 : index
    %c0_11 = arith.constant 0 : index
    %36 = vector.load %arg1[%c0_10, %c0_11] : memref<2x8xi32, #tpu.memory_space<vmem>>, vector<2x8xi32>
    %37 = arith.sitofp %36 : vector<2x8xi32> to vector<2x8xf32>
    %cst_12 = arith.constant 1.000000e+00 : f32
    %38 = vector.broadcast %cst_12 : f32 to vector<2x8xf32>
    %39 = arith.subf %38, %37 : vector<2x8xf32>
    %cst_13 = arith.constant -3.40282347E+38 : f32
    %40 = vector.broadcast %cst_13 : f32 to vector<2x8xf32>
    %41 = arith.mulf %39, %40 : vector<2x8xf32>
    %c0_14 = arith.constant 0 : index
    %c0_15 = arith.constant 0 : index
    %c0_16 = arith.constant 0 : index
    %42 = vector.load %arg3[%c0_14, %c0_15, %c0_16] : memref<2x168x128xf32, #tpu.memory_space<vmem>>, vector<1x32x96xf32>
    %43 = vector.shape_cast %42 : vector<1x32x96xf32> to vector<32x96xf32>
    %c0_17 = arith.constant 0 : index
    %c32 = arith.constant 32 : index
    %c0_18 = arith.constant 0 : index
    %44 = vector.load %arg3[%c0_17, %c32, %c0_18] : memref<2x168x128xf32, #tpu.memory_space<vmem>>, vector<1x32x32xf32>
    %45 = vector.shape_cast %44 : vector<1x32x32xf32> to vector<32x32xf32>
    %c0_19 = arith.constant 0 : index
    %c64 = arith.constant 64 : index
    %c0_20 = arith.constant 0 : index
    %46 = vector.load %arg3[%c0_19, %c64, %c0_20] : memref<2x168x128xf32, #tpu.memory_space<vmem>>, vector<1x32x64xf32>
    %47 = vector.shape_cast %46 : vector<1x32x64xf32> to vector<32x64xf32>
    %c0_21 = arith.constant 0 : index
    %c96 = arith.constant 96 : index
    %c0_22 = arith.constant 0 : index
    %48 = vector.load %arg3[%c0_21, %c96, %c0_22] : memref<2x168x128xf32, #tpu.memory_space<vmem>>, vector<1x64x32xf32>
    %49 = vector.shape_cast %48 : vector<1x64x32xf32> to vector<64x32xf32>
    %c0_23 = arith.constant 0 : index
    %c160 = arith.constant 160 : index
    %c0_24 = arith.constant 0 : index
    %50 = vector.load %arg3[%c0_23, %c160, %c0_24] : memref<2x168x128xf32, #tpu.memory_space<vmem>>, vector<1x8x128xf32>
    %51 = vector.shape_cast %50 : vector<1x8x128xf32> to vector<8x128xf32>
    %52 = vector.extract_strided_slice %51 {offsets = [0, 0], sizes = [1, 96], strides = [1, 1]} : vector<8x128xf32> to vector<1x96xf32>
    %53 = vector.extract_strided_slice %51 {offsets = [1, 0], sizes = [1, 32], strides = [1, 1]} : vector<8x128xf32> to vector<1x32xf32>
    %54 = vector.extract_strided_slice %51 {offsets = [2, 0], sizes = [1, 32], strides = [1, 1]} : vector<8x128xf32> to vector<1x32xf32>
    %55 = vector.extract_strided_slice %51 {offsets = [3, 0], sizes = [1, 32], strides = [1, 1]} : vector<8x128xf32> to vector<1x32xf32>
    %56 = vector.extract_strided_slice %51 {offsets = [4, 0], sizes = [1, 64], strides = [1, 1]} : vector<8x128xf32> to vector<1x64xf32>
    %57 = vector.extract_strided_slice %51 {offsets = [5, 0], sizes = [1, 32], strides = [1, 1]} : vector<8x128xf32> to vector<1x32xf32>
    %58 = vector.extract_strided_slice %51 {offsets = [6, 0], sizes = [1, 32], strides = [1, 1]} : vector<8x128xf32> to vector<1x32xf32>
    %59 = vector.extract_strided_slice %51 {offsets = [7, 0], sizes = [1, 32], strides = [1, 1]} : vector<8x128xf32> to vector<1x32xf32>
    %cst_25 = arith.constant dense<0.000000e+00> : vector<16x96xf32>
    %60 = tpu.matmul %35, %43, %cst_25 {dimension_numbers = #tpu.dot_dimension_numbers<[1], [0], [0], [1], [0, 0, 1, 1], [], []>} : vector<16x32xf32>, vector<32x96xf32>, vector<16x96xf32> -> vector<16x96xf32>
    %61 = vector.broadcast %52 : vector<1x96xf32> to vector<16x96xf32>
    %62 = arith.addf %60, %61 : vector<16x96xf32>
    %63 = vector.extract_strided_slice %41 {offsets = [0, 0], sizes = [1, 8], strides = [1, 1]} : vector<2x8xf32> to vector<1x8xf32>
    %64 = vector.extract_strided_slice %62 {offsets = [0, 0], sizes = [8, 16], strides = [1, 1]} : vector<16x96xf32> to vector<8x16xf32>
    %65 = vector.extract_strided_slice %62 {offsets = [0, 32], sizes = [8, 16], strides = [1, 1]} : vector<16x96xf32> to vector<8x16xf32>
    %66 = vector.extract_strided_slice %62 {offsets = [0, 64], sizes = [8, 16], strides = [1, 1]} : vector<16x96xf32> to vector<8x16xf32>
    %cst_26 = arith.constant dense<0.000000e+00> : vector<8x8xf32>
    %67 = tpu.matmul %64, %65, %cst_26 {dimension_numbers = #tpu.dot_dimension_numbers<[1], [1], [0], [0], [0, 0, 1, 0], [], []>} : vector<8x16xf32>, vector<8x16xf32>, vector<8x8xf32> -> vector<8x8xf32>
    %cst_27 = arith.constant 2.500000e-01 : f32
    %68 = vector.broadcast %cst_27 : f32 to vector<8x8xf32>
    %69 = arith.mulf %67, %68 : vector<8x8xf32>
    %70 = vector.broadcast %63 : vector<1x8xf32> to vector<8x8xf32>
    %71 = arith.addf %69, %70 : vector<8x8xf32>
    %cst_28 = arith.constant dense<0xFF800000> : vector<8xf32>
    %72 = vector.multi_reduction <maximumf>, %71, %cst_28 [1] : vector<8x8xf32> to vector<8xf32>
    %73 = vector.shape_cast %72 : vector<8xf32> to vector<8x1xf32>
    %74 = vector.broadcast %73 : vector<8x1xf32> to vector<8x8xf32>
    %75 = arith.subf %71, %74 : vector<8x8xf32>
    %76 = math.exp %75 : vector<8x8xf32>
    %cst_29 = arith.constant dense<0.000000e+00> : vector<8xf32>
    %77 = vector.multi_reduction <add>, %76, %cst_29 [1] : vector<8x8xf32> to vector<8xf32>
    %78 = vector.shape_cast %77 : vector<8xf32> to vector<8x1xf32>
    %79 = vector.broadcast %78 : vector<8x1xf32> to vector<8x8xf32>
    %80 = arith.divf %76, %79 : vector<8x8xf32>
    %cst_30 = arith.constant dense<0.000000e+00> : vector<8x16xf32>
    %81 = tpu.matmul %80, %66, %cst_30 {dimension_numbers = #tpu.dot_dimension_numbers<[1], [0], [0], [1], [0, 0, 1, 1], [], []>} : vector<8x8xf32>, vector<8x16xf32>, vector<8x16xf32> -> vector<8x16xf32>
    %82 = vector.extract_strided_slice %45 {offsets = [0, 0], sizes = [16, 32], strides = [1, 1]} : vector<32x32xf32> to vector<16x32xf32>
    %cst_31 = arith.constant dense<0.000000e+00> : vector<8x32xf32>
    %83 = tpu.matmul %81, %82, %cst_31 {dimension_numbers = #tpu.dot_dimension_numbers<[1], [0], [0], [1], [0, 0, 1, 1], [], []>} : vector<8x16xf32>, vector<16x32xf32>, vector<8x32xf32> -> vector<8x32xf32>
    %84 = vector.extract_strided_slice %62 {offsets = [0, 16], sizes = [8, 16], strides = [1, 1]} : vector<16x96xf32> to vector<8x16xf32>
    %85 = vector.extract_strided_slice %62 {offsets = [0, 48], sizes = [8, 16], strides = [1, 1]} : vector<16x96xf32> to vector<8x16xf32>
    %86 = vector.extract_strided_slice %62 {offsets = [0, 80], sizes = [8, 16], strides = [1, 1]} : vector<16x96xf32> to vector<8x16xf32>
    %cst_32 = arith.constant dense<0.000000e+00> : vector<8x8xf32>
    %87 = tpu.matmul %84, %85, %cst_32 {dimension_numbers = #tpu.dot_dimension_numbers<[1], [1], [0], [0], [0, 0, 1, 0], [], []>} : vector<8x16xf32>, vector<8x16xf32>, vector<8x8xf32> -> vector<8x8xf32>
    %cst_33 = arith.constant 2.500000e-01 : f32
    %88 = vector.broadcast %cst_33 : f32 to vector<8x8xf32>
    %89 = arith.mulf %87, %88 : vector<8x8xf32>
    %90 = vector.broadcast %63 : vector<1x8xf32> to vector<8x8xf32>
    %91 = arith.addf %89, %90 : vector<8x8xf32>
    %cst_34 = arith.constant dense<0xFF800000> : vector<8xf32>
    %92 = vector.multi_reduction <maximumf>, %91, %cst_34 [1] : vector<8x8xf32> to vector<8xf32>
    %93 = vector.shape_cast %92 : vector<8xf32> to vector<8x1xf32>
    %94 = vector.broadcast %93 : vector<8x1xf32> to vector<8x8xf32>
    %95 = arith.subf %91, %94 : vector<8x8xf32>
    %96 = math.exp %95 : vector<8x8xf32>
    %cst_35 = arith.constant dense<0.000000e+00> : vector<8xf32>
    %97 = vector.multi_reduction <add>, %96, %cst_35 [1] : vector<8x8xf32> to vector<8xf32>
    %98 = vector.shape_cast %97 : vector<8xf32> to vector<8x1xf32>
    %99 = vector.broadcast %98 : vector<8x1xf32> to vector<8x8xf32>
    %100 = arith.divf %96, %99 : vector<8x8xf32>
    %cst_36 = arith.constant dense<0.000000e+00> : vector<8x16xf32>
    %101 = tpu.matmul %100, %86, %cst_36 {dimension_numbers = #tpu.dot_dimension_numbers<[1], [0], [0], [1], [0, 0, 1, 1], [], []>} : vector<8x8xf32>, vector<8x16xf32>, vector<8x16xf32> -> vector<8x16xf32>
    %102 = vector.extract_strided_slice %45 {offsets = [16, 0], sizes = [16, 32], strides = [1, 1]} : vector<32x32xf32> to vector<16x32xf32>
    %cst_37 = arith.constant dense<0.000000e+00> : vector<8x32xf32>
    %103 = tpu.matmul %101, %102, %cst_37 {dimension_numbers = #tpu.dot_dimension_numbers<[1], [0], [0], [1], [0, 0, 1, 1], [], []>} : vector<8x16xf32>, vector<16x32xf32>, vector<8x32xf32> -> vector<8x32xf32>
    %104 = arith.addf %83, %103 : vector<8x32xf32>
    %105 = vector.extract_strided_slice %41 {offsets = [1, 0], sizes = [1, 8], strides = [1, 1]} : vector<2x8xf32> to vector<1x8xf32>
    %106 = vector.extract_strided_slice %62 {offsets = [8, 0], sizes = [8, 16], strides = [1, 1]} : vector<16x96xf32> to vector<8x16xf32>
    %107 = vector.extract_strided_slice %62 {offsets = [8, 32], sizes = [8, 16], strides = [1, 1]} : vector<16x96xf32> to vector<8x16xf32>
    %108 = vector.extract_strided_slice %62 {offsets = [8, 64], sizes = [8, 16], strides = [1, 1]} : vector<16x96xf32> to vector<8x16xf32>
    %cst_38 = arith.constant dense<0.000000e+00> : vector<8x8xf32>
    %109 = tpu.matmul %106, %107, %cst_38 {dimension_numbers = #tpu.dot_dimension_numbers<[1], [1], [0], [0], [0, 0, 1, 0], [], []>} : vector<8x16xf32>, vector<8x16xf32>, vector<8x8xf32> -> vector<8x8xf32>
    %cst_39 = arith.constant 2.500000e-01 : f32
    %110 = vector.broadcast %cst_39 : f32 to vector<8x8xf32>
    %111 = arith.mulf %109, %110 : vector<8x8xf32>
    %112 = vector.broadcast %105 : vector<1x8xf32> to vector<8x8xf32>
    %113 = arith.addf %111, %112 : vector<8x8xf32>
    %cst_40 = arith.constant dense<0xFF800000> : vector<8xf32>
    %114 = vector.multi_reduction <maximumf>, %113, %cst_40 [1] : vector<8x8xf32> to vector<8xf32>
    %115 = vector.shape_cast %114 : vector<8xf32> to vector<8x1xf32>
    %116 = vector.broadcast %115 : vector<8x1xf32> to vector<8x8xf32>
    %117 = arith.subf %113, %116 : vector<8x8xf32>
    %118 = math.exp %117 : vector<8x8xf32>
    %cst_41 = arith.constant dense<0.000000e+00> : vector<8xf32>
    %119 = vector.multi_reduction <add>, %118, %cst_41 [1] : vector<8x8xf32> to vector<8xf32>
    %120 = vector.shape_cast %119 : vector<8xf32> to vector<8x1xf32>
    %121 = vector.broadcast %120 : vector<8x1xf32> to vector<8x8xf32>
    %122 = arith.divf %118, %121 : vector<8x8xf32>
    %cst_42 = arith.constant dense<0.000000e+00> : vector<8x16xf32>
    %123 = tpu.matmul %122, %108, %cst_42 {dimension_numbers = #tpu.dot_dimension_numbers<[1], [0], [0], [1], [0, 0, 1, 1], [], []>} : vector<8x8xf32>, vector<8x16xf32>, vector<8x16xf32> -> vector<8x16xf32>
    %124 = vector.extract_strided_slice %45 {offsets = [0, 0], sizes = [16, 32], strides = [1, 1]} : vector<32x32xf32> to vector<16x32xf32>
    %cst_43 = arith.constant dense<0.000000e+00> : vector<8x32xf32>
    %125 = tpu.matmul %123, %124, %cst_43 {dimension_numbers = #tpu.dot_dimension_numbers<[1], [0], [0], [1], [0, 0, 1, 1], [], []>} : vector<8x16xf32>, vector<16x32xf32>, vector<8x32xf32> -> vector<8x32xf32>
    %126 = vector.extract_strided_slice %62 {offsets = [8, 16], sizes = [8, 16], strides = [1, 1]} : vector<16x96xf32> to vector<8x16xf32>
    %127 = vector.extract_strided_slice %62 {offsets = [8, 48], sizes = [8, 16], strides = [1, 1]} : vector<16x96xf32> to vector<8x16xf32>
    %128 = vector.extract_strided_slice %62 {offsets = [8, 80], sizes = [8, 16], strides = [1, 1]} : vector<16x96xf32> to vector<8x16xf32>
    %cst_44 = arith.constant dense<0.000000e+00> : vector<8x8xf32>
    %129 = tpu.matmul %126, %127, %cst_44 {dimension_numbers = #tpu.dot_dimension_numbers<[1], [1], [0], [0], [0, 0, 1, 0], [], []>} : vector<8x16xf32>, vector<8x16xf32>, vector<8x8xf32> -> vector<8x8xf32>
    %cst_45 = arith.constant 2.500000e-01 : f32
    %130 = vector.broadcast %cst_45 : f32 to vector<8x8xf32>
    %131 = arith.mulf %129, %130 : vector<8x8xf32>
    %132 = vector.broadcast %105 : vector<1x8xf32> to vector<8x8xf32>
    %133 = arith.addf %131, %132 : vector<8x8xf32>
    %cst_46 = arith.constant dense<0xFF800000> : vector<8xf32>
    %134 = vector.multi_reduction <maximumf>, %133, %cst_46 [1] : vector<8x8xf32> to vector<8xf32>
    %135 = vector.shape_cast %134 : vector<8xf32> to vector<8x1xf32>
    %136 = vector.broadcast %135 : vector<8x1xf32> to vector<8x8xf32>
    %137 = arith.subf %133, %136 : vector<8x8xf32>
    %138 = math.exp %137 : vector<8x8xf32>
    %cst_47 = arith.constant dense<0.000000e+00> : vector<8xf32>
    %139 = vector.multi_reduction <add>, %138, %cst_47 [1] : vector<8x8xf32> to vector<8xf32>
    %140 = vector.shape_cast %139 : vector<8xf32> to vector<8x1xf32>
    %141 = vector.broadcast %140 : vector<8x1xf32> to vector<8x8xf32>
    %142 = arith.divf %138, %141 : vector<8x8xf32>
    %cst_48 = arith.constant dense<0.000000e+00> : vector<8x16xf32>
    %143 = tpu.matmul %142, %128, %cst_48 {dimension_numbers = #tpu.dot_dimension_numbers<[1], [0], [0], [1], [0, 0, 1, 1], [], []>} : vector<8x8xf32>, vector<8x16xf32>, vector<8x16xf32> -> vector<8x16xf32>
    %144 = vector.extract_strided_slice %45 {offsets = [16, 0], sizes = [16, 32], strides = [1, 1]} : vector<32x32xf32> to vector<16x32xf32>
    %cst_49 = arith.constant dense<0.000000e+00> : vector<8x32xf32>
    %145 = tpu.matmul %143, %144, %cst_49 {dimension_numbers = #tpu.dot_dimension_numbers<[1], [0], [0], [1], [0, 0, 1, 1], [], []>} : vector<8x16xf32>, vector<16x32xf32>, vector<8x32xf32> -> vector<8x32xf32>
    %146 = arith.addf %125, %145 : vector<8x32xf32>
    %147 = tpu.concatenate %104, %146 in 0 : vector<8x32xf32>, vector<8x32xf32> -> vector<16x32xf32>
    %148 = vector.broadcast %53 : vector<1x32xf32> to vector<16x32xf32>
    %149 = arith.addf %147, %148 : vector<16x32xf32>
    %150 = arith.addf %149, %35 : vector<16x32xf32>
    %cst_50 = arith.constant dense<0.000000e+00> : vector<16xf32>
    %151 = vector.multi_reduction <add>, %150, %cst_50 [1] : vector<16x32xf32> to vector<16xf32>
    %152 = vector.shape_cast %151 : vector<16xf32> to vector<16x1xf32>
    %cst_51 = arith.constant 3.200000e+01 : f32
    %153 = vector.broadcast %cst_51 : f32 to vector<16x1xf32>
    %154 = arith.divf %152, %153 : vector<16x1xf32>
    %155 = vector.broadcast %154 : vector<16x1xf32> to vector<16x32xf32>
    %156 = arith.subf %150, %155 : vector<16x32xf32>
    %157 = arith.mulf %156, %156 : vector<16x32xf32>
    %cst_52 = arith.constant dense<0.000000e+00> : vector<16xf32>
    %158 = vector.multi_reduction <add>, %157, %cst_52 [1] : vector<16x32xf32> to vector<16xf32>
    %159 = vector.shape_cast %158 : vector<16xf32> to vector<16x1xf32>
    %cst_53 = arith.constant 3.200000e+01 : f32
    %160 = vector.broadcast %cst_53 : f32 to vector<16x1xf32>
    %161 = arith.divf %159, %160 : vector<16x1xf32>
    %162 = vector.broadcast %154 : vector<16x1xf32> to vector<16x32xf32>
    %163 = arith.subf %150, %162 : vector<16x32xf32>
    %cst_54 = arith.constant 9.99999996E-13 : f32
    %164 = vector.broadcast %cst_54 : f32 to vector<16x1xf32>
    %165 = arith.addf %161, %164 : vector<16x1xf32>
    %166 = math.rsqrt %165 : vector<16x1xf32>
    %167 = vector.broadcast %166 : vector<16x1xf32> to vector<16x32xf32>
    %168 = arith.mulf %163, %167 : vector<16x32xf32>
    %169 = vector.broadcast %54 : vector<1x32xf32> to vector<16x32xf32>
    %170 = arith.mulf %168, %169 : vector<16x32xf32>
    %171 = vector.broadcast %55 : vector<1x32xf32> to vector<16x32xf32>
    %172 = arith.addf %170, %171 : vector<16x32xf32>
    %cst_55 = arith.constant dense<0.000000e+00> : vector<16x64xf32>
    %173 = tpu.matmul %172, %47, %cst_55 {dimension_numbers = #tpu.dot_dimension_numbers<[1], [0], [0], [1], [0, 0, 1, 1], [], []>} : vector<16x32xf32>, vector<32x64xf32>, vector<16x64xf32> -> vector<16x64xf32>
    %174 = vector.broadcast %56 : vector<1x64xf32> to vector<16x64xf32>
    %175 = arith.addf %173, %174 : vector<16x64xf32>
    %cst_56 = arith.constant 5.000000e-01 : f32
    %176 = vector.broadcast %cst_56 : f32 to vector<16x64xf32>
    %177 = arith.mulf %176, %175 : vector<16x64xf32>
    %cst_57 = arith.constant 4.471500e-02 : f32
    %178 = vector.broadcast %cst_57 : f32 to vector<16x64xf32>
    %179 = arith.mulf %178, %175 : vector<16x64xf32>
    %180 = arith.mulf %179, %175 : vector<16x64xf32>
    %181 = arith.mulf %180, %175 : vector<16x64xf32>
    %182 = arith.addf %175, %181 : vector<16x64xf32>
    %cst_58 = arith.constant 0.797884583 : f32
    %183 = vector.broadcast %cst_58 : f32 to vector<16x64xf32>
    %184 = arith.mulf %183, %182 : vector<16x64xf32>
    %185 = math.tanh %184 : vector<16x64xf32>
    %cst_59 = arith.constant 1.000000e+00 : f32
    %186 = vector.broadcast %cst_59 : f32 to vector<16x64xf32>
    %187 = arith.addf %186, %185 : vector<16x64xf32>
    %188 = arith.mulf %177, %187 : vector<16x64xf32>
    %cst_60 = arith.constant dense<0.000000e+00> : vector<16x32xf32>
    %189 = tpu.matmul %188, %49, %cst_60 {dimension_numbers = #tpu.dot_dimension_numbers<[1], [0], [0], [1], [0, 0, 1, 1], [], []>} : vector<16x64xf32>, vector<64x32xf32>, vector<16x32xf32> -> vector<16x32xf32>
    %190 = vector.broadcast %57 : vector<1x32xf32> to vector<16x32xf32>
    %191 = arith.addf %189, %190 : vector<16x32xf32>
    %192 = arith.addf %191, %172 : vector<16x32xf32>
    %cst_61 = arith.constant dense<0.000000e+00> : vector<16xf32>
    %193 = vector.multi_reduction <add>, %192, %cst_61 [1] : vector<16x32xf32> to vector<16xf32>
    %194 = vector.shape_cast %193 : vector<16xf32> to vector<16x1xf32>
    %cst_62 = arith.constant 3.200000e+01 : f32
    %195 = vector.broadcast %cst_62 : f32 to vector<16x1xf32>
    %196 = arith.divf %194, %195 : vector<16x1xf32>
    %197 = vector.broadcast %196 : vector<16x1xf32> to vector<16x32xf32>
    %198 = arith.subf %192, %197 : vector<16x32xf32>
    %199 = arith.mulf %198, %198 : vector<16x32xf32>
    %cst_63 = arith.constant dense<0.000000e+00> : vector<16xf32>
    %200 = vector.multi_reduction <add>, %199, %cst_63 [1] : vector<16x32xf32> to vector<16xf32>
    %201 = vector.shape_cast %200 : vector<16xf32> to vector<16x1xf32>
    %cst_64 = arith.constant 3.200000e+01 : f32
    %202 = vector.broadcast %cst_64 : f32 to vector<16x1xf32>
    %203 = arith.divf %201, %202 : vector<16x1xf32>
    %204 = vector.broadcast %196 : vector<16x1xf32> to vector<16x32xf32>
    %205 = arith.subf %192, %204 : vector<16x32xf32>
    %cst_65 = arith.constant 9.99999996E-13 : f32
    %206 = vector.broadcast %cst_65 : f32 to vector<16x1xf32>
    %207 = arith.addf %203, %206 : vector<16x1xf32>
    %208 = math.rsqrt %207 : vector<16x1xf32>
    %209 = vector.broadcast %208 : vector<16x1xf32> to vector<16x32xf32>
    %210 = arith.mulf %205, %209 : vector<16x32xf32>
    %211 = vector.broadcast %58 : vector<1x32xf32> to vector<16x32xf32>
    %212 = arith.mulf %210, %211 : vector<16x32xf32>
    %213 = vector.broadcast %59 : vector<1x32xf32> to vector<16x32xf32>
    %214 = arith.addf %212, %213 : vector<16x32xf32>
    %c1 = arith.constant 1 : index
    %c0_66 = arith.constant 0 : index
    %c0_67 = arith.constant 0 : index
    %215 = vector.load %arg3[%c1, %c0_66, %c0_67] : memref<2x168x128xf32, #tpu.memory_space<vmem>>, vector<1x32x96xf32>
    %216 = vector.shape_cast %215 : vector<1x32x96xf32> to vector<32x96xf32>
    %c1_68 = arith.constant 1 : index
    %c32_69 = arith.constant 32 : index
    %c0_70 = arith.constant 0 : index
    %217 = vector.load %arg3[%c1_68, %c32_69, %c0_70] : memref<2x168x128xf32, #tpu.memory_space<vmem>>, vector<1x32x32xf32>
    %218 = vector.shape_cast %217 : vector<1x32x32xf32> to vector<32x32xf32>
    %c1_71 = arith.constant 1 : index
    %c64_72 = arith.constant 64 : index
    %c0_73 = arith.constant 0 : index
    %219 = vector.load %arg3[%c1_71, %c64_72, %c0_73] : memref<2x168x128xf32, #tpu.memory_space<vmem>>, vector<1x32x64xf32>
    %220 = vector.shape_cast %219 : vector<1x32x64xf32> to vector<32x64xf32>
    %c1_74 = arith.constant 1 : index
    %c96_75 = arith.constant 96 : index
    %c0_76 = arith.constant 0 : index
    %221 = vector.load %arg3[%c1_74, %c96_75, %c0_76] : memref<2x168x128xf32, #tpu.memory_space<vmem>>, vector<1x64x32xf32>
    %222 = vector.shape_cast %221 : vector<1x64x32xf32> to vector<64x32xf32>
    %c1_77 = arith.constant 1 : index
    %c160_78 = arith.constant 160 : index
    %c0_79 = arith.constant 0 : index
    %223 = vector.load %arg3[%c1_77, %c160_78, %c0_79] : memref<2x168x128xf32, #tpu.memory_space<vmem>>, vector<1x8x128xf32>
    %224 = vector.shape_cast %223 : vector<1x8x128xf32> to vector<8x128xf32>
    %225 = vector.extract_strided_slice %224 {offsets = [0, 0], sizes = [1, 96], strides = [1, 1]} : vector<8x128xf32> to vector<1x96xf32>
    %226 = vector.extract_strided_slice %224 {offsets = [1, 0], sizes = [1, 32], strides = [1, 1]} : vector<8x128xf32> to vector<1x32xf32>
    %227 = vector.extract_strided_slice %224 {offsets = [2, 0], sizes = [1, 32], strides = [1, 1]} : vector<8x128xf32> to vector<1x32xf32>
    %228 = vector.extract_strided_slice %224 {offsets = [3, 0], sizes = [1, 32], strides = [1, 1]} : vector<8x128xf32> to vector<1x32xf32>
    %229 = vector.extract_strided_slice %224 {offsets = [4, 0], sizes = [1, 64], strides = [1, 1]} : vector<8x128xf32> to vector<1x64xf32>
    %230 = vector.extract_strided_slice %224 {offsets = [5, 0], sizes = [1, 32], strides = [1, 1]} : vector<8x128xf32> to vector<1x32xf32>
    %231 = vector.extract_strided_slice %224 {offsets = [6, 0], sizes = [1, 32], strides = [1, 1]} : vector<8x128xf32> to vector<1x32xf32>
    %232 = vector.extract_strided_slice %224 {offsets = [7, 0], sizes = [1, 32], strides = [1, 1]} : vector<8x128xf32> to vector<1x32xf32>
    %cst_80 = arith.constant dense<0.000000e+00> : vector<16x96xf32>
    %233 = tpu.matmul %214, %216, %cst_80 {dimension_numbers = #tpu.dot_dimension_numbers<[1], [0], [0], [1], [0, 0, 1, 1], [], []>} : vector<16x32xf32>, vector<32x96xf32>, vector<16x96xf32> -> vector<16x96xf32>
    %234 = vector.broadcast %225 : vector<1x96xf32> to vector<16x96xf32>
    %235 = arith.addf %233, %234 : vector<16x96xf32>
    %236 = vector.extract_strided_slice %41 {offsets = [0, 0], sizes = [1, 8], strides = [1, 1]} : vector<2x8xf32> to vector<1x8xf32>
    %237 = vector.extract_strided_slice %235 {offsets = [0, 0], sizes = [8, 16], strides = [1, 1]} : vector<16x96xf32> to vector<8x16xf32>
    %238 = vector.extract_strided_slice %235 {offsets = [0, 32], sizes = [8, 16], strides = [1, 1]} : vector<16x96xf32> to vector<8x16xf32>
    %239 = vector.extract_strided_slice %235 {offsets = [0, 64], sizes = [8, 16], strides = [1, 1]} : vector<16x96xf32> to vector<8x16xf32>
    %cst_81 = arith.constant dense<0.000000e+00> : vector<8x8xf32>
    %240 = tpu.matmul %237, %238, %cst_81 {dimension_numbers = #tpu.dot_dimension_numbers<[1], [1], [0], [0], [0, 0, 1, 0], [], []>} : vector<8x16xf32>, vector<8x16xf32>, vector<8x8xf32> -> vector<8x8xf32>
    %cst_82 = arith.constant 2.500000e-01 : f32
    %241 = vector.broadcast %cst_82 : f32 to vector<8x8xf32>
    %242 = arith.mulf %240, %241 : vector<8x8xf32>
    %243 = vector.broadcast %236 : vector<1x8xf32> to vector<8x8xf32>
    %244 = arith.addf %242, %243 : vector<8x8xf32>
    %cst_83 = arith.constant dense<0xFF800000> : vector<8xf32>
    %245 = vector.multi_reduction <maximumf>, %244, %cst_83 [1] : vector<8x8xf32> to vector<8xf32>
    %246 = vector.shape_cast %245 : vector<8xf32> to vector<8x1xf32>
    %247 = vector.broadcast %246 : vector<8x1xf32> to vector<8x8xf32>
    %248 = arith.subf %244, %247 : vector<8x8xf32>
    %249 = math.exp %248 : vector<8x8xf32>
    %cst_84 = arith.constant dense<0.000000e+00> : vector<8xf32>
    %250 = vector.multi_reduction <add>, %249, %cst_84 [1] : vector<8x8xf32> to vector<8xf32>
    %251 = vector.shape_cast %250 : vector<8xf32> to vector<8x1xf32>
    %252 = vector.broadcast %251 : vector<8x1xf32> to vector<8x8xf32>
    %253 = arith.divf %249, %252 : vector<8x8xf32>
    %cst_85 = arith.constant dense<0.000000e+00> : vector<8x16xf32>
    %254 = tpu.matmul %253, %239, %cst_85 {dimension_numbers = #tpu.dot_dimension_numbers<[1], [0], [0], [1], [0, 0, 1, 1], [], []>} : vector<8x8xf32>, vector<8x16xf32>, vector<8x16xf32> -> vector<8x16xf32>
    %255 = vector.extract_strided_slice %218 {offsets = [0, 0], sizes = [16, 32], strides = [1, 1]} : vector<32x32xf32> to vector<16x32xf32>
    %cst_86 = arith.constant dense<0.000000e+00> : vector<8x32xf32>
    %256 = tpu.matmul %254, %255, %cst_86 {dimension_numbers = #tpu.dot_dimension_numbers<[1], [0], [0], [1], [0, 0, 1, 1], [], []>} : vector<8x16xf32>, vector<16x32xf32>, vector<8x32xf32> -> vector<8x32xf32>
    %257 = vector.extract_strided_slice %235 {offsets = [0, 16], sizes = [8, 16], strides = [1, 1]} : vector<16x96xf32> to vector<8x16xf32>
    %258 = vector.extract_strided_slice %235 {offsets = [0, 48], sizes = [8, 16], strides = [1, 1]} : vector<16x96xf32> to vector<8x16xf32>
    %259 = vector.extract_strided_slice %235 {offsets = [0, 80], sizes = [8, 16], strides = [1, 1]} : vector<16x96xf32> to vector<8x16xf32>
    %cst_87 = arith.constant dense<0.000000e+00> : vector<8x8xf32>
    %260 = tpu.matmul %257, %258, %cst_87 {dimension_numbers = #tpu.dot_dimension_numbers<[1], [1], [0], [0], [0, 0, 1, 0], [], []>} : vector<8x16xf32>, vector<8x16xf32>, vector<8x8xf32> -> vector<8x8xf32>
    %cst_88 = arith.constant 2.500000e-01 : f32
    %261 = vector.broadcast %cst_88 : f32 to vector<8x8xf32>
    %262 = arith.mulf %260, %261 : vector<8x8xf32>
    %263 = vector.broadcast %236 : vector<1x8xf32> to vector<8x8xf32>
    %264 = arith.addf %262, %263 : vector<8x8xf32>
    %cst_89 = arith.constant dense<0xFF800000> : vector<8xf32>
    %265 = vector.multi_reduction <maximumf>, %264, %cst_89 [1] : vector<8x8xf32> to vector<8xf32>
    %266 = vector.shape_cast %265 : vector<8xf32> to vector<8x1xf32>
    %267 = vector.broadcast %266 : vector<8x1xf32> to vector<8x8xf32>
    %268 = arith.subf %264, %267 : vector<8x8xf32>
    %269 = math.exp %268 : vector<8x8xf32>
    %cst_90 = arith.constant dense<0.000000e+00> : vector<8xf32>
    %270 = vector.multi_reduction <add>, %269, %cst_90 [1] : vector<8x8xf32> to vector<8xf32>
    %271 = vector.shape_cast %270 : vector<8xf32> to vector<8x1xf32>
    %272 = vector.broadcast %271 : vector<8x1xf32> to vector<8x8xf32>
    %273 = arith.divf %269, %272 : vector<8x8xf32>
    %cst_91 = arith.constant dense<0.000000e+00> : vector<8x16xf32>
    %274 = tpu.matmul %273, %259, %cst_91 {dimension_numbers = #tpu.dot_dimension_numbers<[1], [0], [0], [1], [0, 0, 1, 1], [], []>} : vector<8x8xf32>, vector<8x16xf32>, vector<8x16xf32> -> vector<8x16xf32>
    %275 = vector.extract_strided_slice %218 {offsets = [16, 0], sizes = [16, 32], strides = [1, 1]} : vector<32x32xf32> to vector<16x32xf32>
    %cst_92 = arith.constant dense<0.000000e+00> : vector<8x32xf32>
    %276 = tpu.matmul %274, %275, %cst_92 {dimension_numbers = #tpu.dot_dimension_numbers<[1], [0], [0], [1], [0, 0, 1, 1], [], []>} : vector<8x16xf32>, vector<16x32xf32>, vector<8x32xf32> -> vector<8x32xf32>
    %277 = arith.addf %256, %276 : vector<8x32xf32>
    %278 = vector.extract_strided_slice %41 {offsets = [1, 0], sizes = [1, 8], strides = [1, 1]} : vector<2x8xf32> to vector<1x8xf32>
    %279 = vector.extract_strided_slice %235 {offsets = [8, 0], sizes = [8, 16], strides = [1, 1]} : vector<16x96xf32> to vector<8x16xf32>
    %280 = vector.extract_strided_slice %235 {offsets = [8, 32], sizes = [8, 16], strides = [1, 1]} : vector<16x96xf32> to vector<8x16xf32>
    %281 = vector.extract_strided_slice %235 {offsets = [8, 64], sizes = [8, 16], strides = [1, 1]} : vector<16x96xf32> to vector<8x16xf32>
    %cst_93 = arith.constant dense<0.000000e+00> : vector<8x8xf32>
    %282 = tpu.matmul %279, %280, %cst_93 {dimension_numbers = #tpu.dot_dimension_numbers<[1], [1], [0], [0], [0, 0, 1, 0], [], []>} : vector<8x16xf32>, vector<8x16xf32>, vector<8x8xf32> -> vector<8x8xf32>
    %cst_94 = arith.constant 2.500000e-01 : f32
    %283 = vector.broadcast %cst_94 : f32 to vector<8x8xf32>
    %284 = arith.mulf %282, %283 : vector<8x8xf32>
    %285 = vector.broadcast %278 : vector<1x8xf32> to vector<8x8xf32>
    %286 = arith.addf %284, %285 : vector<8x8xf32>
    %cst_95 = arith.constant dense<0xFF800000> : vector<8xf32>
    %287 = vector.multi_reduction <maximumf>, %286, %cst_95 [1] : vector<8x8xf32> to vector<8xf32>
    %288 = vector.shape_cast %287 : vector<8xf32> to vector<8x1xf32>
    %289 = vector.broadcast %288 : vector<8x1xf32> to vector<8x8xf32>
    %290 = arith.subf %286, %289 : vector<8x8xf32>
    %291 = math.exp %290 : vector<8x8xf32>
    %cst_96 = arith.constant dense<0.000000e+00> : vector<8xf32>
    %292 = vector.multi_reduction <add>, %291, %cst_96 [1] : vector<8x8xf32> to vector<8xf32>
    %293 = vector.shape_cast %292 : vector<8xf32> to vector<8x1xf32>
    %294 = vector.broadcast %293 : vector<8x1xf32> to vector<8x8xf32>
    %295 = arith.divf %291, %294 : vector<8x8xf32>
    %cst_97 = arith.constant dense<0.000000e+00> : vector<8x16xf32>
    %296 = tpu.matmul %295, %281, %cst_97 {dimension_numbers = #tpu.dot_dimension_numbers<[1], [0], [0], [1], [0, 0, 1, 1], [], []>} : vector<8x8xf32>, vector<8x16xf32>, vector<8x16xf32> -> vector<8x16xf32>
    %297 = vector.extract_strided_slice %218 {offsets = [0, 0], sizes = [16, 32], strides = [1, 1]} : vector<32x32xf32> to vector<16x32xf32>
    %cst_98 = arith.constant dense<0.000000e+00> : vector<8x32xf32>
    %298 = tpu.matmul %296, %297, %cst_98 {dimension_numbers = #tpu.dot_dimension_numbers<[1], [0], [0], [1], [0, 0, 1, 1], [], []>} : vector<8x16xf32>, vector<16x32xf32>, vector<8x32xf32> -> vector<8x32xf32>
    %299 = vector.extract_strided_slice %235 {offsets = [8, 16], sizes = [8, 16], strides = [1, 1]} : vector<16x96xf32> to vector<8x16xf32>
    %300 = vector.extract_strided_slice %235 {offsets = [8, 48], sizes = [8, 16], strides = [1, 1]} : vector<16x96xf32> to vector<8x16xf32>
    %301 = vector.extract_strided_slice %235 {offsets = [8, 80], sizes = [8, 16], strides = [1, 1]} : vector<16x96xf32> to vector<8x16xf32>
    %cst_99 = arith.constant dense<0.000000e+00> : vector<8x8xf32>
    %302 = tpu.matmul %299, %300, %cst_99 {dimension_numbers = #tpu.dot_dimension_numbers<[1], [1], [0], [0], [0, 0, 1, 0], [], []>} : vector<8x16xf32>, vector<8x16xf32>, vector<8x8xf32> -> vector<8x8xf32>
    %cst_100 = arith.constant 2.500000e-01 : f32
    %303 = vector.broadcast %cst_100 : f32 to vector<8x8xf32>
    %304 = arith.mulf %302, %303 : vector<8x8xf32>
    %305 = vector.broadcast %278 : vector<1x8xf32> to vector<8x8xf32>
    %306 = arith.addf %304, %305 : vector<8x8xf32>
    %cst_101 = arith.constant dense<0xFF800000> : vector<8xf32>
    %307 = vector.multi_reduction <maximumf>, %306, %cst_101 [1] : vector<8x8xf32> to vector<8xf32>
    %308 = vector.shape_cast %307 : vector<8xf32> to vector<8x1xf32>
    %309 = vector.broadcast %308 : vector<8x1xf32> to vector<8x8xf32>
    %310 = arith.subf %306, %309 : vector<8x8xf32>
    %311 = math.exp %310 : vector<8x8xf32>
    %cst_102 = arith.constant dense<0.000000e+00> : vector<8xf32>
    %312 = vector.multi_reduction <add>, %311, %cst_102 [1] : vector<8x8xf32> to vector<8xf32>
    %313 = vector.shape_cast %312 : vector<8xf32> to vector<8x1xf32>
    %314 = vector.broadcast %313 : vector<8x1xf32> to vector<8x8xf32>
    %315 = arith.divf %311, %314 : vector<8x8xf32>
    %cst_103 = arith.constant dense<0.000000e+00> : vector<8x16xf32>
    %316 = tpu.matmul %315, %301, %cst_103 {dimension_numbers = #tpu.dot_dimension_numbers<[1], [0], [0], [1], [0, 0, 1, 1], [], []>} : vector<8x8xf32>, vector<8x16xf32>, vector<8x16xf32> -> vector<8x16xf32>
    %317 = vector.extract_strided_slice %218 {offsets = [16, 0], sizes = [16, 32], strides = [1, 1]} : vector<32x32xf32> to vector<16x32xf32>
    %cst_104 = arith.constant dense<0.000000e+00> : vector<8x32xf32>
    %318 = tpu.matmul %316, %317, %cst_104 {dimension_numbers = #tpu.dot_dimension_numbers<[1], [0], [0], [1], [0, 0, 1, 1], [], []>} : vector<8x16xf32>, vector<16x32xf32>, vector<8x32xf32> -> vector<8x32xf32>
    %319 = arith.addf %298, %318 : vector<8x32xf32>
    %320 = tpu.concatenate %277, %319 in 0 : vector<8x32xf32>, vector<8x32xf32> -> vector<16x32xf32>
    %321 = vector.broadcast %226 : vector<1x32xf32> to vector<16x32xf32>
    %322 = arith.addf %320, %321 : vector<16x32xf32>
    %323 = arith.addf %322, %214 : vector<16x32xf32>
    %cst_105 = arith.constant dense<0.000000e+00> : vector<16xf32>
    %324 = vector.multi_reduction <add>, %323, %cst_105 [1] : vector<16x32xf32> to vector<16xf32>
    %325 = vector.shape_cast %324 : vector<16xf32> to vector<16x1xf32>
    %cst_106 = arith.constant 3.200000e+01 : f32
    %326 = vector.broadcast %cst_106 : f32 to vector<16x1xf32>
    %327 = arith.divf %325, %326 : vector<16x1xf32>
    %328 = vector.broadcast %327 : vector<16x1xf32> to vector<16x32xf32>
    %329 = arith.subf %323, %328 : vector<16x32xf32>
    %330 = arith.mulf %329, %329 : vector<16x32xf32>
    %cst_107 = arith.constant dense<0.000000e+00> : vector<16xf32>
    %331 = vector.multi_reduction <add>, %330, %cst_107 [1] : vector<16x32xf32> to vector<16xf32>
    %332 = vector.shape_cast %331 : vector<16xf32> to vector<16x1xf32>
    %cst_108 = arith.constant 3.200000e+01 : f32
    %333 = vector.broadcast %cst_108 : f32 to vector<16x1xf32>
    %334 = arith.divf %332, %333 : vector<16x1xf32>
    %335 = vector.broadcast %327 : vector<16x1xf32> to vector<16x32xf32>
    %336 = arith.subf %323, %335 : vector<16x32xf32>
    %cst_109 = arith.constant 9.99999996E-13 : f32
    %337 = vector.broadcast %cst_109 : f32 to vector<16x1xf32>
    %338 = arith.addf %334, %337 : vector<16x1xf32>
    %339 = math.rsqrt %338 : vector<16x1xf32>
    %340 = vector.broadcast %339 : vector<16x1xf32> to vector<16x32xf32>
    %341 = arith.mulf %336, %340 : vector<16x32xf32>
    %342 = vector.broadcast %227 : vector<1x32xf32> to vector<16x32xf32>
    %343 = arith.mulf %341, %342 : vector<16x32xf32>
    %344 = vector.broadcast %228 : vector<1x32xf32> to vector<16x32xf32>
    %345 = arith.addf %343, %344 : vector<16x32xf32>
    %cst_110 = arith.constant dense<0.000000e+00> : vector<16x64xf32>
    %346 = tpu.matmul %345, %220, %cst_110 {dimension_numbers = #tpu.dot_dimension_numbers<[1], [0], [0], [1], [0, 0, 1, 1], [], []>} : vector<16x32xf32>, vector<32x64xf32>, vector<16x64xf32> -> vector<16x64xf32>
    %347 = vector.broadcast %229 : vector<1x64xf32> to vector<16x64xf32>
    %348 = arith.addf %346, %347 : vector<16x64xf32>
    %cst_111 = arith.constant 5.000000e-01 : f32
    %349 = vector.broadcast %cst_111 : f32 to vector<16x64xf32>
    %350 = arith.mulf %349, %348 : vector<16x64xf32>
    %cst_112 = arith.constant 4.471500e-02 : f32
    %351 = vector.broadcast %cst_112 : f32 to vector<16x64xf32>
    %352 = arith.mulf %351, %348 : vector<16x64xf32>
    %353 = arith.mulf %352, %348 : vector<16x64xf32>
    %354 = arith.mulf %353, %348 : vector<16x64xf32>
    %355 = arith.addf %348, %354 : vector<16x64xf32>
    %cst_113 = arith.constant 0.797884583 : f32
    %356 = vector.broadcast %cst_113 : f32 to vector<16x64xf32>
    %357 = arith.mulf %356, %355 : vector<16x64xf32>
    %358 = math.tanh %357 : vector<16x64xf32>
    %cst_114 = arith.constant 1.000000e+00 : f32
    %359 = vector.broadcast %cst_114 : f32 to vector<16x64xf32>
    %360 = arith.addf %359, %358 : vector<16x64xf32>
    %361 = arith.mulf %350, %360 : vector<16x64xf32>
    %cst_115 = arith.constant dense<0.000000e+00> : vector<16x32xf32>
    %362 = tpu.matmul %361, %222, %cst_115 {dimension_numbers = #tpu.dot_dimension_numbers<[1], [0], [0], [1], [0, 0, 1, 1], [], []>} : vector<16x64xf32>, vector<64x32xf32>, vector<16x32xf32> -> vector<16x32xf32>
    %363 = vector.broadcast %230 : vector<1x32xf32> to vector<16x32xf32>
    %364 = arith.addf %362, %363 : vector<16x32xf32>
    %365 = arith.addf %364, %345 : vector<16x32xf32>
    %cst_116 = arith.constant dense<0.000000e+00> : vector<16xf32>
    %366 = vector.multi_reduction <add>, %365, %cst_116 [1] : vector<16x32xf32> to vector<16xf32>
    %367 = vector.shape_cast %366 : vector<16xf32> to vector<16x1xf32>
    %cst_117 = arith.constant 3.200000e+01 : f32
    %368 = vector.broadcast %cst_117 : f32 to vector<16x1xf32>
    %369 = arith.divf %367, %368 : vector<16x1xf32>
    %370 = vector.broadcast %369 : vector<16x1xf32> to vector<16x32xf32>
    %371 = arith.subf %365, %370 : vector<16x32xf32>
    %372 = arith.mulf %371, %371 : vector<16x32xf32>
    %cst_118 = arith.constant dense<0.000000e+00> : vector<16xf32>
    %373 = vector.multi_reduction <add>, %372, %cst_118 [1] : vector<16x32xf32> to vector<16xf32>
    %374 = vector.shape_cast %373 : vector<16xf32> to vector<16x1xf32>
    %cst_119 = arith.constant 3.200000e+01 : f32
    %375 = vector.broadcast %cst_119 : f32 to vector<16x1xf32>
    %376 = arith.divf %374, %375 : vector<16x1xf32>
    %377 = vector.broadcast %369 : vector<16x1xf32> to vector<16x32xf32>
    %378 = arith.subf %365, %377 : vector<16x32xf32>
    %cst_120 = arith.constant 9.99999996E-13 : f32
    %379 = vector.broadcast %cst_120 : f32 to vector<16x1xf32>
    %380 = arith.addf %376, %379 : vector<16x1xf32>
    %381 = math.rsqrt %380 : vector<16x1xf32>
    %382 = vector.broadcast %381 : vector<16x1xf32> to vector<16x32xf32>
    %383 = arith.mulf %378, %382 : vector<16x32xf32>
    %384 = vector.broadcast %231 : vector<1x32xf32> to vector<16x32xf32>
    %385 = arith.mulf %383, %384 : vector<16x32xf32>
    %386 = vector.broadcast %232 : vector<1x32xf32> to vector<16x32xf32>
    %387 = arith.addf %385, %386 : vector<16x32xf32>
    %c0_121 = arith.constant 0 : index
    %c0_122 = arith.constant 0 : index
    %388 = vector.load %arg4[%c0_121, %c0_122] : memref<40x128xf32, #tpu.memory_space<vmem>>, vector<32x128xf32>
    %c32_123 = arith.constant 32 : index
    %c0_124 = arith.constant 0 : index
    %389 = vector.load %arg4[%c32_123, %c0_124] : memref<40x128xf32, #tpu.memory_space<vmem>>, vector<1x128xf32>
    %390 = vector.extract_strided_slice %387 {offsets = [0, 0], sizes = [1, 32], strides = [1, 1]} : vector<16x32xf32> to vector<1x32xf32>
    %391 = vector.extract_strided_slice %387 {offsets = [8, 0], sizes = [1, 32], strides = [1, 1]} : vector<16x32xf32> to vector<1x32xf32>
    %392 = tpu.concatenate %390, %391 in 0 : vector<1x32xf32>, vector<1x32xf32> -> vector<2x32xf32>
    %cst_125 = arith.constant dense<0.000000e+00> : vector<2x128xf32>
    %393 = tpu.matmul %392, %388, %cst_125 {dimension_numbers = #tpu.dot_dimension_numbers<[1], [0], [0], [1], [0, 0, 1, 1], [], []>} : vector<2x32xf32>, vector<32x128xf32>, vector<2x128xf32> -> vector<2x128xf32>
    %394 = vector.broadcast %389 : vector<1x128xf32> to vector<2x128xf32>
    %395 = arith.addf %393, %394 : vector<2x128xf32>
    %c0_126 = arith.constant 0 : index
    %c0_127 = arith.constant 0 : index
    %396 = vector.load %arg5[%c0_126, %c0_127] : memref<2x128xf32, #tpu.memory_space<vmem>>, vector<2x128xf32>
    tpu.vector_store %arg5[%c0_126, %c0_127], %395 {strides = array<i32>} : memref<2x128xf32, #tpu.memory_space<vmem>>, vector<2x128xf32>,
    return
  }
}

</mosaic_0001>

<bundles_post_ra>
// kernel: tpu_custom_call.1
= control target key start
LH: loop header
LB: loop body
LE: loop exit
PB: predicated region body
PF: predicated region fallthrough
CT: control target
= control target key end

     0   :  { %10 = vsyncpa [#allocation3], 0  ;;  %s4125_s0 = inlined_call_operand.vmem [shape: s32[16,1], index: 0, kind: input, shape index: {}]   ;;  %s4126_s1 = inlined_call_operand.vmem [shape: s32[2,8], index: 1, kind: input, shape index: {}]   ;;  %s4127_s2 = inlined_call_operand.vmem [shape: f32[144,32], index: 2, kind: input, shape index: {}]   ;;  %s4128_s3 = inlined_call_operand.hbm [shape: f32[2,168,128], index: 3, kind: input, shape index: {}]   ;;  %s4129_s4 = inlined_call_operand.vmem [shape: f32[40,128], index: 4, kind: input, shape index: {}]   ;;  %s4130_s5 = inlined_call_operand.hbm [shape: f32[2,128], index: 5, kind: output, shape index: {}]  }
   0x1   :  { %11 = vsyncpa [#allocation4], 0  ;;  %s3665_s18 = smov [#allocation2]   ;;  %s3617_s22 = scalar_lea.hbm %s4128_s3, 5376 }
   0x2   :  { %s23_s19 = sshll.u32 %s3665_s18, 4  ;;  %p3618_p0 = scmp.ne.s32.totalorder %s4128_s3, %s3617_s22  ;;  %s24_s19 = int_to_ptr.vmem [resolvable:$true] %s23_s19 }
   0x3   :  { %p3621_p1 = scmp.lt.u32.totalorder %s3617_s22, %s4128_s3 }
   0x5   :  { %p3623_p2 = pnand %p3621_p1, %p3618_p0 }
   0x7   :  { %3626 = shalt.err (!%p3623_p2)
}
   0x8   :  { %s3627_s27 = scalar_lea.vmem %s24_s19, 5376  ;;  %p3632_p4 = scmp.lt.s32.totalorder %s24_s19, %s24_s19 }
   0x9   :  { %p3628_p3 = scmp.ne.s32.totalorder %s24_s19, %s3627_s27  ;;  %p3633_p5 = scmp.lt.s32.totalorder %s3627_s27, %s3627_s27 }
   0xb   :  { %p3634_p6 = por %p3633_p5, %p3632_p4 }
   0xd   :  { %p3635_p7 = pnand %p3634_p6, %p3628_p3 }
   0xf   :  { %3638 = shalt.err (!%p3635_p7)
}
  0x10   :  { %s3666_s28 = smov 128   ;;  %s3667_s29 = smov 8  }
  0x11   :  { %29 = dma.hbm_to_vmem [thread:$0]  %s4128_s3, 5376, %s24_s19, [#allocation3], %s3666_s28, %s3666_s28, %s3667_s29  }
  0x12   :  { %3661 = dma.done.wait [#allocation3], 5376  }
  0x13   :  { %3662 = vsyncadd [#allocation3], 4294961920  ;;  %v3668_v0 = vmov 0   ;;  %v35_v1 = vld [vmem:[%s4125_s0] sm:$0xff]  ;;  %v52_v3 = vld [vmem:[%s4127_s2 + $0x8] sm:$0xff]  ;;  %v37_v27 = vlaneseq  ;;  %v3669_v30 = vmov 1.0  }
  0x14   :  { %3556 = vset.pattern.permute.xlu0 %v3668_v0  ;;  %v51_v2 = vld [vmem:[%s4127_s2] sm:$0xff]  ;;  %v53_v4 = vld [vmem:[%s4127_s2 + $0x10] sm:$0xff]  ;;  %v54_v5 = vld [vmem:[%s4127_s2 + $0x18] sm:$0xff]  ;;  %vm144_vm2 = vcmask 261120   ;;  %vm3671_vm3 = vmmov 0   ;;  %s3673_s19 = smov 96  }
  0x15   :  { %40 = vperm.xlu0 %3556, %v35_v1   ;;  %v36_v6 = vld [vmem:[%s4125_s0 + $0x8] sm:$0xff]  ;;  %v3416_v7 = vpack.c.bf16 %v52_v3, %v51_v2  ;;  %v3420_v8 = vpack.c.bf16 %v54_v5, %v53_v4  ;;  %v55_v9 = vld [vmem:[%s4127_s2 + $0x20] sm:$0xff]  ;;  %v57_v12 = vld [vmem:[%s4127_s2 + $0x30] sm:$0xff]  ;;  %v38_v28 = vand.u32 127, %v37_v27  ;;  %v3782_v60 = vshrl.u32 %v37_v27, 7  ;;  %s3674_s22 = smov 112  }
  0x16   :  { %v56_v10 = vld [vmem:[%s4127_s2 + $0x28] sm:$0xff]  ;;  %v58_v13 = vld [vmem:[%s4127_s2 + $0x38] sm:$0xff]  ;;  %v59_v15 = vld [vmem:[%s4127_s2 + $0x40] sm:$0xff]  ;;  %vm297_vm4 = vcmask 130048   ;;  %vm378_vm5 = vcmask 64512   ;;  %s3676_s23 = smov 48  }
  0x17   :  { %3417 = vmatprep.subr.bf16.mxu0 %v3416_v7  ;;  %v3424_v11 = vpack.c.bf16 %v56_v10, %v55_v9  ;;  %v3428_v14 = vpack.c.bf16 %v58_v13, %v57_v12  ;;  %v60_v16 = vld [vmem:[%s4127_s2 + $0x48] sm:$0xff]  ;;  %v61_v18 = vld [vmem:[%s4127_s2 + $0x50] sm:$0xff]  ;;  %v62_v19 = vld [vmem:[%s4127_s2 + $0x58] sm:$0xff]  ;;  %v3785_v62 = vsub.s32 0, %v3782_v60  ;;  %v3791_v0 = vsub.s32 1, %v3782_v60  ;;  %s3678_s8 = smov [#allocation5]  }
  0x18   :  { %3419 = vmatpush3.bf16.msra.mxu0 %v3416_v7  ;;  %v3432_v17 = vpack.c.bf16 %v60_v16, %v59_v15  ;;  %v3436_v20 = vpack.c.bf16 %v62_v19, %v61_v18  ;;  %v63_v21 = vld [vmem:[%s4127_s2 + $0x60] sm:$0xff]  ;;  %v64_v22 = vld [vmem:[%s4127_s2 + $0x68] sm:$0xff]  ;;  %v65_v24 = vld [vmem:[%s4127_s2 + $0x70] sm:$0xff]  ;;  %vm1415_vm6 = vcmask 523264   ;;  %vm2884_vm7 = vcmask 1040384   ;;  %s2970_s9 = sshll.u32 %s3678_s8, 4  ;;  %s2971_s9 = int_to_ptr.vmem [resolvable:$true] %s2970_s9 }
  0x19   :  { %43 = vperm.xlu0 %3556, %v36_v6   ;;  %3421 = vmatprep.subr.bf16.mxu0 %v3420_v8  ;;  %v3440_v23 = vpack.c.bf16 %v64_v22, %v63_v21  ;;  %v66_v25 = vld [vmem:[%s4127_s2 + $0x78] sm:$0xff]  ;;  %v67_v32 = vld [vmem:[%s4127_s2 + $0x80] sm:$0xff]  ;;  %v188_v49 = vld [vmem:[#allocation2] sm:$0xff]  ;;  %s3639_s10 = scalar_lea.vmem %s2971_s9, 32  ;;  %p3644_p9 = scmp.lt.s32.totalorder %s2971_s9, %s2971_s9 }
  0x1a   :  { %v3444_v26 = vpack.c.bf16 %v66_v25, %v65_v24  ;;  %v189_v50 = vld [vmem:[#allocation2 + $0x8] sm:$0xff]  ;;  %v190_v51 = vld [vmem:[#allocation2 + $0x10] sm:$0xff]  ;;  %v191_v53 = vld [vmem:[#allocation2 + $0x18] sm:$0xff]  ;;  %p3640_p8 = scmp.ne.s32.totalorder %s2971_s9, %s3639_s10  ;;  %p3645_p10 = scmp.lt.s32.totalorder %s3639_s10, %s3639_s10 }
  0x1b   :  { %v3448_v52 = vpack.c.bf16 %v189_v50, %v188_v49  ;;  %v3452_v54 = vpack.c.bf16 %v191_v53, %v190_v51  ;;  %v143_v63 = vld [vmem:[%s4127_s2 + $0x88] sm:$0x3]  ;;  %v3809_v12 = vld [vmem:[#allocation2 + $0xa0] sm:$0xff]  ;;  %s3672_s2 = smov 64  }
  0x1c   :  { %3423 = vmatpush3.bf16.msra.mxu0 %v3420_v8  ;;  %v175_v1 = vrot.slane %v143_v63, %v3785_v62  ;;  %v181_v4 = vrot.slane %v143_v63, %v3791_v0  ;;  %v212_v13 = vrot.slane %v3809_v12, %v3785_v62  ;;  %p3646_p11 = por %p3645_p10, %p3644_p9 }
  0x1d   :  { %3425 = vmatprep.subr.bf16.mxu0 %v3424_v11  ;;  %3449 = vmatprep.subr.bf16.mxu1 %v3448_v52 }
  0x1e   :  { %3451 = vmatpush3.bf16.msra.mxu1 %v3448_v52  ;;  %p3647_p12 = pnand %p3646_p11, %p3640_p8 }
  0x1f   :  { %3453 = vmatprep.subr.bf16.mxu1 %v3452_v54 }
  0x20   :  { %3427 = vmatpush3.bf16.msra.mxu0 %v3424_v11  ;;  %v3670_v11 = vmov 0.0  }
  0x21   :  { %3429 = vmatprep.subr.bf16.mxu0 %v3428_v14 }
  0x22   :  { %3455 = vmatpush3.bf16.msra.mxu1 %v3452_v54 }
  0x23   :  { %3198 = vmatprep.subr.mxu1 %v3670_v11 }
  0x24   :  { %3431 = vmatpush3.bf16.msra.mxu0 %v3428_v14 }
  0x25   :  { %3433 = vmatprep.subr.bf16.mxu0 %v3432_v17 }
  0x28   :  { %3435 = vmatpush3.bf16.msra.mxu0 %v3432_v17 }
  0x29   :  { %3437 = vmatprep.subr.bf16.mxu0 %v3436_v20 }
  0x2c   :  { %3439 = vmatpush3.bf16.msra.mxu0 %v3436_v20  ;;  %v184_v20 = vld [vmem:[%s4126_s1] sm:$0x3]  ;;  %s3675_s1 = smov 80  }
  0x2d   :  { %3441 = vmatprep.subr.bf16.mxu0 %v3440_v23  ;;  %v185_v21 = vcvt.s32.f32 %v184_v20 }
  0x2f   :  { %v186_v22 = vsub.f32 1.0, %v185_v21 }
  0x30   :  { %3443 = vmatpush3.bf16.msra.mxu0 %v3440_v23 }
  0x31   :  { %3445 = vmatprep.subr.bf16.mxu0 %v3444_v26  ;;  %v3831_v23 = vmul.f32 -3.4028235e+38, %v186_v22 }
  0x33   :  { %v3835_v24 = vrot.slane %v3831_v23, %v3785_v62 }
  0x34   :  { %3447 = vmatpush3.bf16.msra.mxu0 %v3444_v26 }
  0x35   :  { %3232 = vmatprep.subr.mxu0 %v3670_v11 }
  0x94   :  { %v41_v29 = vpop.permute.xlu0 %40 }
  0x95   :  { %vm45_vm0 = vcmp.eq.s32.totalorder %v38_v28, %v41_v29 }
  0x96   :  { %3184 = vmatprep.mubr.msk.f32.mxu0 %vm45_vm0, %v3669_v30 }
  0x98   :  { %v44_v31 = vpop.permute.xlu0 %43 }
  0x99   :  { %vm46_vm1 = vcmp.eq.s32.totalorder %v38_v28, %v44_v31 }
  0x9a   :  { %3185 = vmatmul.mubr.msk.f32.vlgmr.msra.gmra.mrb[0].mxu0 %vm46_vm1, %v3669_v30 }
  0x9b   :  { %3234 = vmatprep.mubr.msk.f32.mxu0 %vm3671_vm3, %v3670_v11 }
 0x16d   :  { %v3186_v33 = vpop.f32.mrb[0].mxu0 }
 0x16e   :  { %v134_v34 = vpop.f32.mrb[1].mxu0  ;;  %v140_v36 = vadd.f32 %v3186_v33, %v67_v32 }
 0x16f   :  { %v135_v35 = vadd.f32 %v134_v34, %v67_v32 }
 0x170   :  { %v148_v38 = vsel %vm144_vm2, %v140_v36, 0.0 }
 0x171   :  { %v145_v37 = vsel %vm144_vm2, %v135_v35, 0.0 }
 0x172   :  { %146 = vadd.xlane.f32.xlu1 %v145_v37 }
 0x176   :  { %149 = vadd.xlane.f32.xlu1 %v148_v38 }
 0x1ff   :  { %v147_v39 = vpop.xlane.xlu1 %146 }
 0x200   :  { %v152_v40 = vmul.f32 0.03125, %v147_v39 }
 0x202   :  { %v154_v41 = vsub.f32 %v135_v35, %v152_v40 }
 0x203   :  { %v150_v42 = vpop.xlane.xlu1 %149 }
 0x204   :  { %v153_v43 = vmul.f32 0.03125, %v150_v42  ;;  %v156_v44 = vmul.f32 %v154_v41, %v154_v41 }
 0x206   :  { %v155_v45 = vsub.f32 %v140_v36, %v153_v43  ;;  %v158_v46 = vsel %vm144_vm2, %v156_v44, 0.0 }
 0x207   :  { %159 = vadd.xlane.f32.xlu0 %v158_v46 }
 0x208   :  { %v157_v47 = vmul.f32 %v155_v45, %v155_v45 }
 0x20a   :  { %v161_v48 = vsel %vm144_vm2, %v157_v47, 0.0 }
 0x20b   :  { %162 = vadd.xlane.f32.xlu1 %v161_v48 }
 0x294   :  { %v160_v55 = vpop.xlane.xlu0 %159 }
 0x295   :  { %v164_v56 = vmul.f32 0.03125, %v160_v55 }
 0x297   :  { %v166_v57 = vadd.f32 1e-12, %v164_v56 }
 0x298   :  { %v163_v58 = vpop.xlane.xlu1 %162 }
 0x299   :  { %3557 = vrsqrt.f32 %v166_v57  ;;  %v165_v59 = vmul.f32 0.03125, %v163_v58 }
 0x29b   :  { %v167_v61 = vadd.f32 1e-12, %v165_v59  ;;  %v3878_v59 = vrot.slane %v3831_v23, %v3791_v0 }
 0x29d   :  { %3559 = vrsqrt.f32 %v167_v61 }
 0x2a3   :  { %v3558_v2 = vpop.eup %3557 }
 0x2a4   :  { %v170_v3 = vmul.f32 %v3558_v2, %v154_v41 }
 0x2a6   :  { %v176_v5 = vmul.f32 %v175_v1, %v170_v3 }
 0x2a7   :  { %v3560_v6 = vpop.eup %3559 }
 0x2a8   :  { %v171_v7 = vmul.f32 %v3560_v6, %v155_v45  ;;  %v3795_v8 = vadd.f32 %v181_v4, %v176_v5 }
 0x2aa   :  { %v177_v9 = vmul.f32 %v175_v1, %v171_v7  ;;  %3195 = vmatprep.mubr.msk.f32.mxu1 %vm144_vm2, %v3795_v8 }
 0x2ac   :  { %v3799_v10 = vadd.f32 %v181_v4, %v177_v9 }
 0x2ae   :  { %3196 = vmatmul.mubr.msk.f32.vlgmr.msra.gmra.mrb[0].mxu1 %vm144_vm2, %v3799_v10 }
 0x2af   :  { %3200 = vmatprep.mubr.msk.f32.mxu1 %vm3671_vm3, %v3670_v11 }
 0x381   :  { %v3197_v14 = vpop.f32.mrb[0].mxu1 }
 0x382   :  { %v3813_v15 = vadd.f32 %v3197_v14, %v212_v13  ;;  %v285_v16 = vpop.f32.mrb[1].mxu1 }
 0x383   :  { %v3815_v17 = vadd.f32 %v285_v16, %v212_v13 }
 0x385   :  { %390 = vrot.lane.b32.xlu0 %v3815_v17, %s3672_s2  ;;  %295 = vrot.lane.b32.xlu1 %v3815_v17, %s3673_s19 }
 0x3f7   :  { %v296_v18 = vpop.permute.xlu1 %295  ;;  %v391_v19 = vpop.permute.xlu0 %390 }
 0x3f8   :  { %3199 = vmatpush3.xpose.msk.msra.mxu1 %vm297_vm4, %v296_v18 }
 0x3f9   :  { %3203 = vmatprep.subr.mxu1 %v3670_v11 }
 0x3fb   :  { %3201 = vmatmul.mubr.msk.f32.vlgmr.msra.gmra.mrb[2].mxu1 %vm297_vm4, %v3815_v17 }
 0x3fc   :  { %3204 = vmatpush3.msra.mxu1 %v391_v19  ;;  %3205 = vmatprep.mubr.msk.f32.mxu1 %vm3671_vm3, %v3670_v11 }
 0x3fd   :  { %3208 = vmatprep.subr.mxu1 %v3670_v11 }
 0x4ce   :  { %v368_v25 = vpop.f32.mrb[2].mxu1 }
 0x4cf   :  { %v372_v26 = vmul.f32 0.25, %v368_v25  ;;  %v3202_v27 = vpop.f32.mrb[3].mxu1  ;;  %v194_v25 = vld [vmem:[#allocation2 + $0x30] sm:$0xff] }
 0x4d0   :  { %v3677_v27 = vmov 0.0|0.0  }
 0x4d1   :  { %v377_v28 = vadd.f32 %v3835_v24, %v372_v26  ;;  %v195_v26 = vld [vmem:[#allocation2 + $0x38] sm:$0xff] }
 0x4d3   :  { %v379_v29 = vsel %vm378_vm5, %v377_v28, -inf }
 0x4d4   :  { %380 = vmax.xlane.f32.xlu1 %v379_v29 }
 0x4e5   :  { %466 = vrot.lane.b32.xlu1 %v3815_v17, %s3674_s22 }
 0x561   :  { %v381_v30 = vpop.xlane.xlu1 %380 }
 0x562   :  { %v382_v31 = vsub.f32 %v377_v28, %v381_v30  ;;  %v3457_v28 = vpack.c.bf16 %v195_v26, %v194_v25 }
 0x564   :  { %v383_v32 = vmul.f32 1.442695, %v382_v31  ;;  %v192_v31 = vld [vmem:[#allocation2 + $0x20] sm:$0xff] }
 0x565   :  { %v467_v42 = vpop.permute.xlu1 %466 }
 0x566   :  { %3561 = vpow2.f32 %v383_v32  ;;  %v193_v32 = vld [vmem:[#allocation2 + $0x28] sm:$0xff] }
 0x570   :  { %v3562_v33 = vpop.eup %3561 }
 0x571   :  { %v385_v34 = vsel %vm378_vm5, %v3562_v33, 0.0 }
 0x572   :  { %386 = vadd.xlane.f32.xlu0 %v385_v34 }
 0x588   :  { %468 = vrot.lane.b32.xlu0 %v3815_v17, %s3675_s1 }
 0x58c   :  { %780 = vrot.lane.b32.xlu0 %v3813_v15, %s3673_s19 }
 0x590   :  { %951 = vrot.lane.b32.xlu0 %v3813_v15, %s3675_s1 }
 0x594   :  { %949 = vrot.lane.b32.xlu0 %v3813_v15, %s3674_s22 }
 0x5ff   :  { %v387_v35 = vpop.xlane.xlu0 %386 }
 0x600   :  { %3563 = vrcp.f32 %v387_v35 }
 0x603   :  { %v469_v36 = vpop.permute.xlu0 %468 }
 0x607   :  { %v781_v37 = vpop.permute.xlu0 %780 }
 0x608   :  { %3233 = vmatpush3.xpose.msk.msra.mxu0 %vm297_vm4, %v781_v37 }
 0x609   :  { %3242 = vmatprep.subr.mxu0 %v3670_v11 }
 0x60a   :  { %v3564_v38 = vpop.eup %3563 }
 0x60b   :  { %v389_v39 = vmul.f32 %v3564_v38, %v3562_v33  ;;  %3235 = vmatmul.mubr.msk.f32.vlgmr.msra.gmra.mrb[2].mxu0 %vm297_vm4, %v3813_v15  ;;  %v952_v40 = vpop.permute.xlu0 %951  ;;  %v3460_v33 = vpack.c.bf16 %v193_v32, %v192_v31  ;;  %v198_v31 = vld [vmem:[#allocation2 + $0x50] sm:$0xff]  ;;  %v199_v32 = vld [vmem:[#allocation2 + $0x58] sm:$0xff] }
 0x60c   :  { %3243 = vmatpush3.xpose.msk.msra.mxu0 %vm297_vm4, %v952_v40  ;;  %3244 = vmatprep.mubr.msk.f32.mxu0 %vm3671_vm3, %v3670_v11 }
 0x60d   :  { %3206 = vmatmul.mubr.msk.f32.vlgmr.msra.gmra.mrb[4].mxu1 %vm378_vm5, %v389_v39  ;;  %3462 = vmatprep.subr.bf16.mxu0 %v3677_v27 }
 0x60e   :  { %3209 = vmatpush3.xpose.msk.msra.mxu1 %vm297_vm4, %v469_v36  ;;  %3210 = vmatprep.mubr.msk.f32.mxu1 %vm3671_vm3, %v3670_v11 }
 0x60f   :  { %v950_v41 = vpop.permute.xlu0 %949  ;;  %3213 = vmatprep.subr.mxu1 %v3670_v11 }
 0x610   :  { %3245 = vmatmul.mubr.msk.f32.vlgmr.msra.gmra.mrb[4].mxu0 %vm297_vm4, %v950_v41 }
 0x611   :  { %3211 = vmatmul.mubr.msk.f32.vlgmr.msra.gmra.mrb[6].mxu1 %vm297_vm4, %v467_v42  ;;  %3256 = vmatprep.mubr.msk.f32.mxu0 %vm3671_vm3, %v3670_v11 }
 0x612   :  { %3215 = vmatprep.mubr.msk.f32.mxu1 %vm3671_vm3, %v3670_v11  ;;  %3464 = vmatpush3.bf16.msra.mxu0 %v3457_v28 }
 0x6de   :  { %v852_v43 = vpop.f32.mrb[2].mxu0 }
 0x6df   :  { %v3236_v44 = vpop.f32.mrb[3].mxu0  ;;  %v856_v58 = vmul.f32 0.25, %v852_v43  ;;  %v1265_v43 = vrot.slane %v3809_v12, %v3791_v0 }
 0x6e0   :  { %v3868_v45 = vpop.f32.mrb[4].mxu1 }
 0x6e1   :  { %v3207_v46 = vpop.f32.mrb[5].mxu1  ;;  %v861_v2 = vadd.f32 %v3878_v59, %v856_v58 }
 0x6e3   :  { %v1023_v47 = vpop.f32.mrb[4].mxu0  ;;  %v862_v3 = vsel %vm378_vm5, %v861_v2, -inf }
 0x6e4   :  { %v540_v48 = vpop.f32.mrb[6].mxu1  ;;  %v3246_v49 = vpop.f32.mrb[5].mxu0  ;;  %v1027_v63 = vmul.f32 0.25, %v1023_v47 }
 0x6e5   :  { %v544_v50 = vmul.f32 0.25, %v540_v48  ;;  %v3212_v51 = vpop.f32.mrb[7].mxu1 }
 0x6e6   :  { %v1028_v4 = vadd.f32 %v1027_v63, %v3878_v59 }
 0x6e7   :  { %v545_v52 = vadd.f32 %v544_v50, %v3835_v24 }
 0x6e8   :  { %v1029_v5 = vsel %vm378_vm5, %v1028_v4, -inf }
 0x6e9   :  { %v546_v53 = vsel %vm378_vm5, %v545_v52, -inf }
 0x6ea   :  { %547 = vmax.xlane.f32.xlu0 %v546_v53 }
 0x700   :  { %557 = vrot.lane.b32.xlu0 %v3815_v17, %s3676_s23 }
 0x704   :  { %873 = vrot.lane.b32.xlu0 %v3813_v15, %s3672_s2 }
 0x777   :  { %v548_v54 = vpop.xlane.xlu0 %547 }
 0x778   :  { %v549_v55 = vsub.f32 %v545_v52, %v548_v54 }
 0x77a   :  { %v550_v56 = vmul.f32 1.442695, %v549_v55 }
 0x77b   :  { %v558_v57 = vpop.permute.xlu0 %557 }
 0x77c   :  { %3565 = vpow2.f32 %v550_v56  ;;  %3214 = vmatpush3.msra.mxu1 %v558_v57 }
 0x77d   :  { %3456 = vmatprep.subr.bf16.mxu1 %v3677_v27 }
 0x77f   :  { %v874_v36 = vpop.permute.xlu0 %873 }
 0x786   :  { %v3566_v61 = vpop.eup %3565 }
 0x787   :  { %v552_v1 = vsel %vm378_vm5, %v3566_v61, 0.0 }
 0x788   :  { %553 = vadd.xlane.f32.xlu1 %v552_v1 }
 0x78c   :  { %863 = vmax.xlane.f32.xlu1 %v862_v3 }
 0x790   :  { %1030 = vmax.xlane.f32.xlu1 %v1029_v5 }
 0x815   :  { %v554_v6 = vpop.xlane.xlu1 %553 }
 0x816   :  { %3567 = vrcp.f32 %v554_v6 }
 0x819   :  { %v864_v7 = vpop.xlane.xlu1 %863 }
 0x81a   :  { %v865_v9 = vsub.f32 %v861_v2, %v864_v7 }
 0x81c   :  { %v866_v13 = vmul.f32 1.442695, %v865_v9 }
 0x81d   :  { %v1031_v14 = vpop.xlane.xlu1 %1030 }
 0x81e   :  { %3569 = vpow2.f32 %v866_v13  ;;  %v1032_v16 = vsub.f32 %v1028_v4, %v1031_v14  ;;  %v1298_v13 = vsub.s32 2, %v3782_v60  ;;  %v1304_v14 = vsub.s32 3, %v3782_v60 }
 0x820   :  { %v3568_v17 = vpop.eup %3567  ;;  %v1033_v18 = vmul.f32 1.442695, %v1032_v16  ;;  %v1299_v16 = vrot.slane %v3809_v12, %v1298_v13 }
 0x821   :  { %v556_v19 = vmul.f32 %v3568_v17, %v3566_v61 }
 0x822   :  { %3571 = vpow2.f32 %v1033_v18 }
 0x823   :  { %3216 = vmatmul.mubr.msk.f32.vlgmr.msra.gmra.mrb[8].mxu1 %vm378_vm5, %v556_v19 }
 0x824   :  { %3222 = vmatprep.mubr.msk.f32.mxu1 %vm3671_vm3, %v3670_v11  ;;  %3458 = vmatpush3.bf16.msra.mxu1 %v3457_v28  ;;  %v196_v28 = vld [vmem:[#allocation2 + $0x40] sm:$0xff] }
 0x825   :  { %3459 = vmatprep.subr.bf16.mxu1 %v3677_v27 }
 0x828   :  { %v3570_v20 = vpop.eup %3569 }
 0x829   :  { %v868_v21 = vsel %vm378_vm5, %v3570_v20, 0.0 }
 0x82a   :  { %869 = vadd.xlane.f32.xlu1 %v868_v21 }
 0x82c   :  { %v3572_v22 = vpop.eup %3571 }
 0x82d   :  { %v1035_v23 = vsel %vm378_vm5, %v3572_v22, 0.0 }
 0x82e   :  { %1036 = vadd.xlane.f32.xlu1 %v1035_v23 }
 0x83f   :  { %1040 = vrot.lane.b32.xlu1 %v3813_v15, %s3676_s23 }
 0x8b7   :  { %v870_v29 = vpop.xlane.xlu1 %869 }
 0x8b8   :  { %3573 = vrcp.f32 %v870_v29  ;;  %v197_v29 = vld [vmem:[#allocation2 + $0x48] sm:$0xff] }
 0x8bb   :  { %v1037_v30 = vpop.xlane.xlu1 %1036 }
 0x8bc   :  { %3575 = vrcp.f32 %v1037_v30  ;;  %v3468_v30 = vpack.c.bf16 %v197_v29, %v196_v28 }
 0x8be   :  { %3469 = vmatprep.subr.bf16.mxu0 %v3468_v30 }
 0x8bf   :  { %v1041_v39 = vpop.permute.xlu1 %1040 }
 0x8c2   :  { %v3574_v35 = vpop.eup %3573 }
 0x8c3   :  { %v872_v37 = vmul.f32 %v3574_v35, %v3570_v20 }
 0x8c6   :  { %v3576_v38 = vpop.eup %3575 }
 0x8c7   :  { %v1039_v40 = vmul.f32 %v3576_v38, %v3572_v22 }
 0x8f6   :  { %v629_v15 = vpop.f32.mrb[8].mxu1 }
 0x8f7   :  { %v3217_v34 = vpop.f32.mrb[9].mxu1  ;;  %3223 = vmatmul.mubr.msk.f32.vlgmr.msra.gmra.mrb[10].mxu1 %vm297_vm4, %v629_v15 }
 0x8f8   :  { %3461 = vmatpush3.bf16.msra.mxu1 %v3460_v33  ;;  %3229 = vmatprep.mubr.msk.f32.mxu1 %vm3671_vm3, %v3670_v11 }
 0x8f9   :  { %3237 = vmatprep.subr.mxu1 %v3670_v11 }
 0x8fb   :  { %3230 = vmatmul.mubr.msk.f32.vlgmr.msra.gmra.mrb[12].mxu1 %vm297_vm4, %v3868_v45 }
 0x8fc   :  { %3238 = vmatpush3.msra.mxu1 %v874_v36  ;;  %3239 = vmatprep.mubr.msk.f32.mxu1 %vm3671_vm3, %v3670_v11 }
 0x8fd   :  { %3247 = vmatprep.subr.mxu1 %v3670_v11 }
 0x8ff   :  { %3240 = vmatmul.mubr.msk.f32.vlgmr.msra.gmra.mrb[14].mxu1 %vm378_vm5, %v872_v37 }
 0x900   :  { %3248 = vmatpush3.msra.mxu1 %v1041_v39  ;;  %3249 = vmatprep.mubr.msk.f32.mxu1 %vm3671_vm3, %v3670_v11 }
 0x901   :  { %3465 = vmatprep.subr.bf16.mxu1 %v3677_v27 }
 0x903   :  { %3250 = vmatmul.mubr.msk.f32.vlgmr.msra.gmra.mrb[16].mxu1 %vm378_vm5, %v1039_v40  ;;  %v200_v40 = vld [vmem:[#allocation2 + $0x60] sm:$0xff] }
 0x904   :  { %3467 = vmatpush3.bf16.msra.mxu1 %v3460_v33  ;;  %3263 = vmatprep.mubr.msk.f32.mxu1 %vm3671_vm3, %v3670_v11  ;;  %v3472_v33 = vpack.c.bf16 %v199_v32, %v198_v31 }
 0x9ca   :  { %v702_v41 = vpop.f32.mrb[10].mxu1 }
 0x9cb   :  { %v3224_v42 = vpop.f32.mrb[11].mxu1 }
 0x9ce   :  { %v775_v44 = vpop.f32.mrb[12].mxu1 }
 0x9cf   :  { %v776_v45 = vadd.f32 %v775_v44, %v702_v41  ;;  %v3231_v46 = vpop.f32.mrb[13].mxu1  ;;  %v201_v41 = vld [vmem:[#allocation2 + $0x68] sm:$0xff]  ;;  %v203_v44 = vld [vmem:[#allocation2 + $0x78] sm:$0xff] }
 0x9d0   :  { %v3476_v42 = vpack.c.bf16 %v201_v41, %v200_v40  ;;  %v204_v46 = vld [vmem:[#allocation2 + $0x80] sm:$0xff] }
 0x9d1   :  { %v1266_v47 = vadd.f32 %v1265_v43, %v776_v45 }
 0x9d2   :  { %v945_v48 = vpop.f32.mrb[14].mxu1  ;;  %3477 = vmatprep.subr.bf16.mxu1 %v3476_v42 }
 0x9d3   :  { %v3241_v49 = vpop.f32.mrb[15].mxu1  ;;  %3264 = vmatmul.mubr.msk.f32.vlgmr.msra.gmra.mrb[18].mxu1 %vm297_vm4, %v945_v48  ;;  %v1268_v50 = vadd.f32 %v1266_v47, %v3795_v8  ;;  %v205_v47 = vld [vmem:[#allocation2 + $0x88] sm:$0xff] }
 0x9d4   :  { %3479 = vmatpush3.bf16.msra.mxu1 %v3476_v42  ;;  %v3484_v48 = vpack.c.bf16 %v205_v47, %v204_v46  ;;  %v206_v49 = vld [vmem:[#allocation2 + $0x90] sm:$0xff]  ;;  %v1541_v46 = vld [vmem:[#allocation2 + $0xc0] sm:$0xff] }
 0x9d5   :  { %v1270_v51 = vsel %vm144_vm2, %v1268_v50, 0.0 }
 0x9d6   :  { %1271 = vadd.xlane.f32.xlu0 %v1270_v51  ;;  %v1112_v52 = vpop.f32.mrb[16].mxu1 }
 0x9d7   :  { %v3251_v53 = vpop.f32.mrb[17].mxu1  ;;  %3257 = vmatmul.mubr.msk.f32.vlgmr.msra.gmra.mrb[6].mxu0 %vm297_vm4, %v1112_v52  ;;  %v1310_v52 = vsub.s32 4, %v3782_v60 }
 0x9d8   :  { %3471 = vmatpush3.bf16.msra.mxu0 %v3468_v30 }
 0x9d9   :  { %3473 = vmatprep.subr.bf16.mxu0 %v3472_v33  ;;  %v1311_v53 = vrot.slane %v3809_v12, %v1310_v52 }
 0x9dc   :  { %3475 = vmatpush3.bf16.msra.mxu0 %v3472_v33 }
 0xa63   :  { %v1272_v54 = vpop.xlane.xlu0 %1271 }
 0xa64   :  { %v1276_v55 = vmul.f32 0.03125, %v1272_v54 }
 0xa66   :  { %v1278_v56 = vsub.f32 %v1268_v50, %v1276_v55  ;;  %v207_v50 = vld [vmem:[#allocation2 + $0x98] sm:$0xff] }
 0xa67   :  { %v3488_v51 = vpack.c.bf16 %v207_v50, %v206_v49 }
 0xa68   :  { %v1280_v57 = vmul.f32 %v1278_v56, %v1278_v56 }
 0xa6a   :  { %v1282_v58 = vsel %vm144_vm2, %v1280_v57, 0.0 }
 0xa6b   :  { %1283 = vadd.xlane.f32.xlu0 %v1282_v58 }
 0xaa6   :  { %v1258_v61 = vpop.f32.mrb[18].mxu1 }
 0xaa7   :  { %v3265_v63 = vpop.f32.mrb[19].mxu1 }
 0xaaa   :  { %v1185_v1 = vpop.f32.mrb[6].mxu0 }
 0xaab   :  { %v1259_v2 = vadd.f32 %v1258_v61, %v1185_v1  ;;  %v3258_v3 = vpop.f32.mrb[7].mxu0 }
 0xaad   :  { %v1267_v8 = vadd.f32 %v1265_v43, %v1259_v2  ;;  %v202_v43 = vld [vmem:[#allocation2 + $0x70] sm:$0xff] }
 0xaae   :  { %v3480_v45 = vpack.c.bf16 %v203_v44, %v202_v43  ;;  %v1538_v43 = vld [vmem:[#allocation2 + $0xa8] sm:$0xff] }
 0xaaf   :  { %v1269_v4 = vadd.f32 %v1267_v8, %v3799_v10  ;;  %v1305_v10 = vrot.slane %v3809_v12, %v1304_v14 }
 0xab0   :  { %3481 = vmatprep.subr.bf16.mxu1 %v3480_v45 }
 0xab1   :  { %v1273_v5 = vsel %vm144_vm2, %v1269_v4, 0.0  ;;  %3483 = vmatpush3.bf16.msra.mxu1 %v3480_v45  ;;  %v1540_v45 = vld [vmem:[#allocation2 + $0xb8] sm:$0xff] }
 0xab2   :  { %1274 = vadd.xlane.f32.xlu1 %v1273_v5  ;;  %3485 = vmatprep.subr.bf16.mxu1 %v3484_v48  ;;  %v3496_v47 = vpack.c.bf16 %v1541_v46, %v1540_v45 }
 0xab5   :  { %3487 = vmatpush3.bf16.msra.mxu1 %v3484_v48 }
 0xab6   :  { %3489 = vmatprep.subr.bf16.mxu1 %v3488_v51 }
 0xab9   :  { %3491 = vmatpush3.bf16.msra.mxu1 %v3488_v51 }
 0xaba   :  { %3312 = vmatprep.subr.mxu1 %v3670_v11 }
 0xaf8   :  { %v1284_v6 = vpop.xlane.xlu0 %1283 }
 0xaf9   :  { %v1288_v7 = vmul.f32 0.03125, %v1284_v6 }
 0xafb   :  { %v1290_v9 = vadd.f32 1e-12, %v1288_v7 }
 0xafd   :  { %3577 = vrsqrt.f32 %v1290_v9 }
 0xb07   :  { %v3578_v17 = vpop.eup %3577 }
 0xb08   :  { %v1294_v18 = vmul.f32 %v3578_v17, %v1278_v56 }
 0xb0a   :  { %v1300_v19 = vmul.f32 %v1299_v16, %v1294_v18 }
 0xb0c   :  { %v3928_v20 = vadd.f32 %v1305_v10, %v1300_v19 }
 0xb0e   :  { %3274 = vmatprep.mubr.msk.f32.mxu0 %vm144_vm2, %v3928_v20 }
 0xb3f   :  { %v1275_v21 = vpop.xlane.xlu1 %1274 }
 0xb40   :  { %v1277_v22 = vmul.f32 0.03125, %v1275_v21 }
 0xb42   :  { %v1279_v23 = vsub.f32 %v1269_v4, %v1277_v22  ;;  %v1413_v22 = vsub.s32 5, %v3782_v60 }
 0xb44   :  { %v1281_v25 = vmul.f32 %v1279_v23, %v1279_v23 }
 0xb46   :  { %v1285_v26 = vsel %vm144_vm2, %v1281_v25, 0.0 }
 0xb47   :  { %1286 = vadd.xlane.f32.xlu0 %v1285_v26 }
 0xbd4   :  { %v1287_v15 = vpop.xlane.xlu0 %1286 }
 0xbd5   :  { %v1289_v34 = vmul.f32 0.03125, %v1287_v15 }
 0xbd7   :  { %v1291_v35 = vadd.f32 1e-12, %v1289_v34 }
 0xbd9   :  { %3579 = vrsqrt.f32 %v1291_v35 }
 0xbe3   :  { %v3580_v36 = vpop.eup %3579 }
 0xbe4   :  { %v1295_v37 = vmul.f32 %v3580_v36, %v1279_v23  ;;  %v1414_v23 = vrot.slane %v3809_v12, %v1413_v22 }
 0xbe6   :  { %v1301_v38 = vmul.f32 %v1299_v16, %v1295_v37 }
 0xbe8   :  { %v1307_v39 = vadd.f32 %v1305_v10, %v1301_v38 }
 0xbea   :  { %3275 = vmatmul.mubr.msk.f32.vlgmr.msra.gmra.mrb[8].mxu0 %vm144_vm2, %v1307_v39 }
 0xcbd   :  { %v3276_v54 = vpop.f32.mrb[8].mxu0 }
 0xcbe   :  { %v1390_v55 = vadd.f32 %v3276_v54, %v1311_v53  ;;  %v1384_v56 = vpop.f32.mrb[9].mxu0 }
 0xcbf   :  { %v1385_v57 = vadd.f32 %v1384_v56, %v1311_v53  ;;  %v1533_v56 = vsub.s32 7, %v3782_v60 }
 0xcc0   :  { %v1396_v58 = vmul.f32 0.044715, %v1390_v55  ;;  %v1394_v10 = vmul.f32 0.5, %v1390_v55 }
 0xcc1   :  { %v1395_v61 = vmul.f32 0.044715, %v1385_v57  ;;  %v1393_v17 = vmul.f32 0.5, %v1385_v57 }
 0xcc2   :  { %v1398_v63 = vmul.f32 %v1396_v58, %v1390_v55 }
 0xcc3   :  { %v1397_v1 = vmul.f32 %v1395_v61, %v1385_v57 }
 0xcc4   :  { %v1400_v2 = vmul.f32 %v1398_v63, %v1390_v55  ;;  %v1534_v63 = vrot.slane %v3809_v12, %v1533_v56 }
 0xcc5   :  { %v1399_v3 = vmul.f32 %v1397_v1, %v1385_v57 }
 0xcc6   :  { %v1402_v8 = vadd.f32 %v1400_v2, %v1390_v55  ;;  %v1527_v55 = vsub.s32 6, %v3782_v60 }
 0xcc7   :  { %v1401_v4 = vadd.f32 %v1399_v3, %v1385_v57 }
 0xcc8   :  { %v1404_v5 = vmul.f32 0.7978846, %v1402_v8  ;;  %v1528_v57 = vrot.slane %v3809_v12, %v1527_v55 }
 0xcc9   :  { %v1403_v6 = vmul.f32 0.7978846, %v1401_v4 }
 0xcca   :  { %3581 = vtanh.f32 %v1404_v5 }
 0xccb   :  { %3583 = vtanh.f32 %v1403_v6  ;;  %v3971_v6 = vld [vmem:[#allocation2 + $0x148] sm:$0xff] }
 0xccc   :  { %v1562_v12 = vrot.slane %v3971_v6, %v3785_v62 }
 0xcd4   :  { %v3582_v7 = vpop.eup %3581 }
 0xcd5   :  { %v3584_v9 = vpop.eup %3583  ;;  %v1408_v16 = vadd.f32 1.0, %v3582_v7 }
 0xcd6   :  { %v1407_v18 = vadd.f32 1.0, %v3584_v9 }
 0xcd7   :  { %v1410_v21 = vmul.f32 %v1408_v16, %v1394_v10 }
 0xcd8   :  { %v1409_v19 = vmul.f32 %v1407_v18, %v1393_v17 }
 0xcda   :  { %3293 = vmatprep.mubr.msk.f32.mxu1 %vm1415_vm6, %v1409_v19 }
 0xcdb   :  { %3294 = vmatmul.mubr.msk.f32.vlgmr.msra.gmra.mrb[20].mxu1 %vm1415_vm6, %v1410_v21 }
 0xcdc   :  { %3314 = vmatprep.mubr.msk.f32.mxu1 %vm3671_vm3, %v3670_v11 }
 0xdae   :  { %v3295_v25 = vpop.f32.mrb[20].mxu1 }
 0xdaf   :  { %v1488_v26 = vpop.f32.mrb[21].mxu1  ;;  %v1494_v28 = vadd.f32 %v3295_v25, %v1414_v23 }
 0xdb0   :  { %v1489_v29 = vadd.f32 %v1488_v26, %v1414_v23 }
 0xdb1   :  { %v1498_v32 = vadd.f32 %v1494_v28, %v1307_v39  ;;  %v1539_v39 = vld [vmem:[#allocation2 + $0xb0] sm:$0xff] }
 0xdb2   :  { %v1497_v30 = vadd.f32 %v1489_v29, %v3928_v20  ;;  %v3492_v44 = vpack.c.bf16 %v1539_v39, %v1538_v43  ;;  %v1545_v43 = vld [vmem:[#allocation2 + $0xe0] sm:$0xff] }
 0xdb3   :  { %v1502_v33 = vsel %vm144_vm2, %v1498_v32, 0.0 }
 0xdb4   :  { %v1499_v31 = vsel %vm144_vm2, %v1497_v30, 0.0  ;;  %3493 = vmatprep.subr.bf16.mxu0 %v3492_v44 }
 0xdb5   :  { %1500 = vadd.xlane.f32.xlu0 %v1499_v31  ;;  %3495 = vmatpush3.bf16.msra.mxu0 %v3492_v44 }
 0xdb6   :  { %3497 = vmatprep.subr.bf16.mxu0 %v3496_v47 }
 0xdb9   :  { %1503 = vadd.xlane.f32.xlu0 %v1502_v33  ;;  %3499 = vmatpush3.bf16.msra.mxu0 %v3496_v47 }
 0xdba   :  { %3307 = vmatprep.subr.mxu0 %v3670_v11 }
 0xe42   :  { %v1501_v15 = vpop.xlane.xlu0 %1500 }
 0xe43   :  { %v1505_v34 = vmul.f32 0.03125, %v1501_v15 }
 0xe45   :  { %v1507_v35 = vsub.f32 %v1497_v30, %v1505_v34 }
 0xe46   :  { %v1504_v36 = vpop.xlane.xlu0 %1503 }
 0xe47   :  { %v1506_v37 = vmul.f32 0.03125, %v1504_v36  ;;  %v1509_v38 = vmul.f32 %v1507_v35, %v1507_v35 }
 0xe49   :  { %v1508_v40 = vsub.f32 %v1498_v32, %v1506_v37  ;;  %v1511_v41 = vsel %vm144_vm2, %v1509_v38, 0.0 }
 0xe4a   :  { %1512 = vadd.xlane.f32.xlu0 %v1511_v41 }
 0xe4b   :  { %v1510_v42 = vmul.f32 %v1508_v40, %v1508_v40 }
 0xe4d   :  { %v1514_v20 = vsel %vm144_vm2, %v1510_v42, 0.0 }
 0xe4e   :  { %1515 = vadd.xlane.f32.xlu1 %v1514_v20  ;;  %v1544_v20 = vld [vmem:[#allocation2 + $0xd8] sm:$0xff] }
 0xe4f   :  { %v3501_v39 = vpack.c.bf16 %v1545_v43, %v1544_v20 }
 0xed7   :  { %v1513_v48 = vpop.xlane.xlu0 %1512 }
 0xed8   :  { %v1517_v49 = vmul.f32 0.03125, %v1513_v48  ;;  %v1542_v48 = vld [vmem:[#allocation2 + $0xc8] sm:$0xff] }
 0xeda   :  { %v1519_v50 = vadd.f32 1e-12, %v1517_v49  ;;  %v1543_v49 = vld [vmem:[#allocation2 + $0xd0] sm:$0xff] }
 0xedb   :  { %v1516_v51 = vpop.xlane.xlu1 %1515 }
 0xedc   :  { %3585 = vrsqrt.f32 %v1519_v50  ;;  %v1518_v53 = vmul.f32 0.03125, %v1516_v51 }
 0xede   :  { %v1520_v54 = vadd.f32 1e-12, %v1518_v53  ;;  %v4009_v53 = vpack.c.bf16 %v1543_v49, %v1542_v48 }
 0xee0   :  { %3587 = vrsqrt.f32 %v1520_v54 }
 0xee6   :  { %v3586_v58 = vpop.eup %3585 }
 0xee7   :  { %v1523_v61 = vmul.f32 %v3586_v58, %v1507_v35 }
 0xee9   :  { %v1529_v1 = vmul.f32 %v1528_v57, %v1523_v61 }
 0xeea   :  { %v3588_v2 = vpop.eup %3587 }
 0xeeb   :  { %v1524_v3 = vmul.f32 %v3588_v2, %v1508_v40  ;;  %v3961_v8 = vadd.f32 %v1534_v63, %v1529_v1 }
 0xeed   :  { %v1530_v4 = vmul.f32 %v1528_v57, %v1524_v3  ;;  %3304 = vmatprep.mubr.msk.f32.mxu0 %vm144_vm2, %v3961_v8 }
 0xeef   :  { %v3965_v5 = vadd.f32 %v1534_v63, %v1530_v4 }
 0xef1   :  { %3305 = vmatmul.mubr.msk.f32.vlgmr.msra.gmra.mrb[10].mxu0 %vm144_vm2, %v3965_v5 }
 0xef2   :  { %3309 = vmatprep.mubr.msk.f32.mxu0 %vm3671_vm3, %v3670_v11 }
 0xfc4   :  { %v3306_v7 = vpop.f32.mrb[10].mxu0 }
 0xfc5   :  { %v3975_v9 = vadd.f32 %v3306_v7, %v1562_v12  ;;  %v1635_v16 = vpop.f32.mrb[11].mxu0 }
 0xfc6   :  { %v1636_v17 = vadd.f32 %v1635_v16, %v1562_v12 }
 0xfc8   :  { %1812 = vrot.lane.b32.xlu1 %v1636_v17, %s3675_s1  ;;  %1645 = vrot.lane.b32.xlu0 %v1636_v17, %s3673_s19 }
 0xfcc   :  { %1810 = vrot.lane.b32.xlu1 %v1636_v17, %s3674_s22 }
0x103a   :  { %v1646_v18 = vpop.permute.xlu0 %1645  ;;  %v1813_v10 = vpop.permute.xlu1 %1812 }
0x103b   :  { %3308 = vmatpush3.xpose.msk.msra.mxu0 %vm297_vm4, %v1646_v18 }
0x103c   :  { %3317 = vmatprep.subr.mxu0 %v3670_v11 }
0x103e   :  { %3310 = vmatmul.mubr.msk.f32.vlgmr.msra.gmra.mrb[12].mxu0 %vm297_vm4, %v1636_v17  ;;  %v1811_v62 = vpop.permute.xlu1 %1810 }
0x103f   :  { %3318 = vmatpush3.xpose.msk.msra.mxu0 %vm297_vm4, %v1813_v10  ;;  %3319 = vmatprep.mubr.msk.f32.mxu0 %vm3671_vm3, %v3670_v11 }
0x1040   :  { %3500 = vmatprep.subr.bf16.mxu0 %v3677_v27 }
0x1042   :  { %3320 = vmatmul.mubr.msk.f32.vlgmr.msra.gmra.mrb[14].mxu0 %vm297_vm4, %v1811_v62 }
0x1043   :  { %3331 = vmatprep.mubr.msk.f32.mxu0 %vm3671_vm3, %v3670_v11  ;;  %3502 = vmatpush3.bf16.msra.mxu0 %v3501_v39 }
0x1044   :  { %3341 = vmatprep.subr.mxu0 %v3670_v11 }
0x1111   :  { %v1717_v19 = vpop.f32.mrb[12].mxu0 }
0x1112   :  { %v1721_v21 = vmul.f32 0.25, %v1717_v19  ;;  %v3311_v23 = vpop.f32.mrb[13].mxu0 }
0x1114   :  { %v1722_v25 = vadd.f32 %v1721_v21, %v3835_v24 }
0x1115   :  { %v1884_v26 = vpop.f32.mrb[14].mxu0 }
0x1116   :  { %v1888_v28 = vmul.f32 0.25, %v1884_v26  ;;  %v3321_v29 = vpop.f32.mrb[15].mxu0  ;;  %v1723_v30 = vsel %vm378_vm5, %v1722_v25, -inf }
0x1117   :  { %1724 = vmax.xlane.f32.xlu0 %v1723_v30 }
0x1118   :  { %v1889_v31 = vadd.f32 %v1888_v28, %v3835_v24 }
0x111a   :  { %v1890_v32 = vsel %vm378_vm5, %v1889_v31, -inf }
0x111b   :  { %1891 = vmax.xlane.f32.xlu1 %v1890_v32 }
0x112c   :  { %1734 = vrot.lane.b32.xlu1 %v1636_v17, %s3672_s2 }
0x1130   :  { %2124 = vrot.lane.b32.xlu1 %v3975_v9, %s3673_s19 }
0x1134   :  { %2291 = vrot.lane.b32.xlu1 %v3975_v9, %s3675_s1 }
0x11a4   :  { %v1725_v33 = vpop.xlane.xlu0 %1724 }
0x11a5   :  { %v1726_v15 = vsub.f32 %v1722_v25, %v1725_v33 }
0x11a7   :  { %v1727_v34 = vmul.f32 1.442695, %v1726_v15 }
0x11a8   :  { %v1892_v35 = vpop.xlane.xlu1 %1891 }
0x11a9   :  { %3589 = vpow2.f32 %v1727_v34  ;;  %v1893_v36 = vsub.f32 %v1889_v31, %v1892_v35 }
0x11ab   :  { %v1894_v37 = vmul.f32 1.442695, %v1893_v36 }
0x11ac   :  { %v1735_v38 = vpop.permute.xlu1 %1734 }
0x11ad   :  { %3591 = vpow2.f32 %v1894_v37  ;;  %3313 = vmatpush3.msra.mxu1 %v1735_v38 }
0x11ae   :  { %3322 = vmatprep.subr.mxu1 %v3670_v11 }
0x11b0   :  { %v2125_v61 = vpop.permute.xlu1 %2124 }
0x11b3   :  { %v3590_v24 = vpop.eup %3589 }
0x11b4   :  { %v1729_v40 = vsel %vm378_vm5, %v3590_v24, 0.0  ;;  %v2292_v2 = vpop.permute.xlu1 %2291 }
0x11b5   :  { %1730 = vadd.xlane.f32.xlu0 %v1729_v40 }
0x11b7   :  { %v3592_v41 = vpop.eup %3591 }
0x11b8   :  { %v1896_v42 = vsel %vm378_vm5, %v3592_v41, 0.0 }
0x11b9   :  { %1897 = vadd.xlane.f32.xlu0 %v1896_v42 }
0x11cf   :  { %1901 = vrot.lane.b32.xlu0 %v1636_v17, %s3676_s23 }
0x11d3   :  { %2289 = vrot.lane.b32.xlu0 %v3975_v9, %s3674_s22 }
0x1242   :  { %v1731_v44 = vpop.xlane.xlu0 %1730 }
0x1243   :  { %3593 = vrcp.f32 %v1731_v44 }
0x1246   :  { %v1898_v45 = vpop.xlane.xlu0 %1897 }
0x1247   :  { %3595 = vrcp.f32 %v1898_v45 }
0x124a   :  { %v1902_v50 = vpop.permute.xlu0 %1901 }
0x124d   :  { %v3594_v46 = vpop.eup %3593 }
0x124e   :  { %v1733_v47 = vmul.f32 %v3594_v46, %v3590_v24  ;;  %v2290_v3 = vpop.permute.xlu0 %2289 }
0x1250   :  { %3315 = vmatmul.mubr.msk.f32.vlgmr.msra.gmra.mrb[22].mxu1 %vm378_vm5, %v1733_v47 }
0x1251   :  { %v3596_v51 = vpop.eup %3595  ;;  %3323 = vmatpush3.msra.mxu1 %v1902_v50  ;;  %3324 = vmatprep.mubr.msk.f32.mxu1 %vm3671_vm3, %v3670_v11 }
0x1252   :  { %v1900_v54 = vmul.f32 %v3596_v51, %v3592_v41  ;;  %3503 = vmatprep.subr.bf16.mxu1 %v3677_v27 }
0x1254   :  { %3325 = vmatmul.mubr.msk.f32.vlgmr.msra.gmra.mrb[24].mxu1 %vm378_vm5, %v1900_v54 }
0x1255   :  { %3505 = vmatpush3.bf16.msra.mxu1 %v4009_v53  ;;  %3338 = vmatprep.mubr.msk.f32.mxu1 %vm3671_vm3, %v3670_v11 }
0x1256   :  { %3346 = vmatprep.subr.mxu1 %v3670_v11 }
0x1323   :  { %v1806_v57 = vpop.f32.mrb[22].mxu1 }
0x1324   :  { %v3316_v58 = vpop.f32.mrb[23].mxu1  ;;  %3339 = vmatmul.mubr.msk.f32.vlgmr.msra.gmra.mrb[26].mxu1 %vm297_vm4, %v1806_v57 }
0x1325   :  { %3348 = vmatprep.mubr.msk.f32.mxu1 %vm3671_vm3, %v3670_v11 }
0x1327   :  { %v1973_v63 = vpop.f32.mrb[24].mxu1 }
0x1328   :  { %v3326_v1 = vpop.f32.mrb[25].mxu1  ;;  %3332 = vmatmul.mubr.msk.f32.vlgmr.msra.gmra.mrb[16].mxu0 %vm297_vm4, %v1973_v63 }
0x1329   :  { %3342 = vmatpush3.xpose.msk.msra.mxu0 %vm297_vm4, %v2125_v61  ;;  %3343 = vmatprep.mubr.msk.f32.mxu0 %vm3671_vm3, %v3670_v11 }
0x132a   :  { %3351 = vmatprep.subr.mxu0 %v3670_v11 }
0x132c   :  { %3344 = vmatmul.mubr.msk.f32.vlgmr.msra.gmra.mrb[18].mxu0 %vm297_vm4, %v3975_v9 }
0x132d   :  { %3352 = vmatpush3.xpose.msk.msra.mxu0 %vm297_vm4, %v2292_v2  ;;  %3353 = vmatprep.mubr.msk.f32.mxu0 %vm3671_vm3, %v3670_v11 }
0x132e   :  { %3506 = vmatprep.subr.bf16.mxu0 %v3677_v27 }
0x1330   :  { %3354 = vmatmul.mubr.msk.f32.vlgmr.msra.gmra.mrb[20].mxu0 %vm297_vm4, %v2290_v3 }
0x1331   :  { %3508 = vmatpush3.bf16.msra.mxu0 %v3501_v39  ;;  %3365 = vmatprep.mubr.msk.f32.mxu0 %vm3671_vm3, %v3670_v11 }
0x13f7   :  { %v2119_v4 = vpop.f32.mrb[26].mxu1 }
0x13f8   :  { %v3340_v12 = vpop.f32.mrb[27].mxu1 }
0x13fb   :  { %v2046_v7 = vpop.f32.mrb[16].mxu0 }
0x13fc   :  { %v2120_v16 = vadd.f32 %v2119_v4, %v2046_v7  ;;  %v3333_v17 = vpop.f32.mrb[17].mxu0 }
0x13ff   :  { %v2196_v18 = vpop.f32.mrb[18].mxu0 }
0x1400   :  { %v2200_v10 = vmul.f32 0.25, %v2196_v18  ;;  %v3345_v62 = vpop.f32.mrb[19].mxu0 }
0x1402   :  { %v2201_v19 = vadd.f32 %v2200_v10, %v3878_v59 }
0x1403   :  { %v2363_v21 = vpop.f32.mrb[20].mxu0 }
0x1404   :  { %v2367_v23 = vmul.f32 0.25, %v2363_v21  ;;  %v3355_v25 = vpop.f32.mrb[21].mxu0  ;;  %v2202_v26 = vsel %vm378_vm5, %v2201_v19, -inf }
0x1405   :  { %2203 = vmax.xlane.f32.xlu1 %v2202_v26  ;;  %v2645_v25 = vrot.slane %v3971_v6, %v1304_v14 }
0x1406   :  { %v2368_v28 = vadd.f32 %v2367_v23, %v3878_v59  ;;  %v2605_v59 = vrot.slane %v3971_v6, %v3791_v0 }
0x1408   :  { %v2369_v29 = vsel %vm378_vm5, %v2368_v28, -inf  ;;  %v2606_v24 = vadd.f32 %v2605_v59, %v2120_v16 }
0x1409   :  { %2370 = vmax.xlane.f32.xlu0 %v2369_v29  ;;  %v1546_v29 = vld [vmem:[#allocation2 + $0xe8] sm:$0xff] }
0x140a   :  { %v2608_v40 = vadd.f32 %v2606_v24, %v3961_v8  ;;  %v1551_v24 = vld [vmem:[#allocation2 + $0x110] sm:$0xff] }
0x140c   :  { %v2610_v41 = vsel %vm144_vm2, %v2608_v40, 0.0 }
0x1492   :  { %v2204_v30 = vpop.xlane.xlu1 %2203 }
0x1493   :  { %v2205_v31 = vsub.f32 %v2201_v19, %v2204_v30  ;;  %v1547_v30 = vld [vmem:[#allocation2 + $0xf0] sm:$0xff] }
0x1495   :  { %v2206_v32 = vmul.f32 1.442695, %v2205_v31  ;;  %v3512_v31 = vpack.c.bf16 %v1547_v30, %v1546_v29 }
0x1496   :  { %v2371_v33 = vpop.xlane.xlu0 %2370 }
0x1497   :  { %3597 = vpow2.f32 %v2206_v32  ;;  %v2372_v15 = vsub.f32 %v2368_v28, %v2371_v33  ;;  %3513 = vmatprep.subr.bf16.mxu0 %v3512_v31  ;;  %v1548_v32 = vld [vmem:[#allocation2 + $0xf8] sm:$0xff]  ;;  %v1549_v33 = vld [vmem:[#allocation2 + $0x100] sm:$0xff] }
0x1499   :  { %v2373_v34 = vmul.f32 1.442695, %v2372_v15 }
0x149b   :  { %3599 = vpow2.f32 %v2373_v34 }
0x14a1   :  { %v3598_v35 = vpop.eup %3597 }
0x14a2   :  { %v2208_v36 = vsel %vm378_vm5, %v3598_v35, 0.0 }
0x14a3   :  { %2209 = vadd.xlane.f32.xlu0 %v2208_v36 }
0x14a5   :  { %v3600_v37 = vpop.eup %3599 }
0x14a6   :  { %v2375_v38 = vsel %vm378_vm5, %v3600_v37, 0.0 }
0x14a7   :  { %2376 = vadd.xlane.f32.xlu1 %v2375_v38 }
0x14b8   :  { %2380 = vrot.lane.b32.xlu1 %v3975_v9, %s3676_s23 }
0x14b9   :  { %2213 = vrot.lane.b32.xlu0 %v3975_v9, %s3672_s2 }
0x14dc   :  { %2611 = vadd.xlane.f32.xlu1 %v2610_v41  ;;  %v1552_v41 = vld [vmem:[#allocation2 + $0x118] sm:$0xff] }
0x1530   :  { %v2210_v42 = vpop.xlane.xlu0 %2209 }
0x1531   :  { %3601 = vrcp.f32 %v2210_v42  ;;  %v1553_v42 = vld [vmem:[#allocation2 + $0x120] sm:$0xff] }
0x1534   :  { %v2377_v20 = vpop.xlane.xlu1 %2376  ;;  %v2214_v43 = vpop.permute.xlu0 %2213 }
0x1535   :  { %3603 = vrcp.f32 %v2377_v20  ;;  %3347 = vmatpush3.msra.mxu1 %v2214_v43  ;;  %v3524_v20 = vpack.c.bf16 %v1553_v42, %v1552_v41  ;;  %v1554_v43 = vld [vmem:[#allocation2 + $0x128] sm:$0xff] }
0x1536   :  { %3356 = vmatprep.subr.mxu1 %v3670_v11 }
0x1538   :  { %v2381_v9 = vpop.permute.xlu1 %2380 }
0x153b   :  { %v3602_v39 = vpop.eup %3601 }
0x153c   :  { %v2212_v44 = vmul.f32 %v3602_v39, %v3598_v35  ;;  %v1555_v39 = vld [vmem:[#allocation2 + $0x130] sm:$0xff] }
0x153e   :  { %3349 = vmatmul.mubr.msk.f32.vlgmr.msra.gmra.mrb[28].mxu1 %vm378_vm5, %v2212_v44  ;;  %v3528_v44 = vpack.c.bf16 %v1555_v39, %v1554_v43  ;;  %v2867_v39 = vrot.slane %v3971_v6, %v1527_v55  ;;  %v3027_v55 = vld [vmem:[%s4129_s4 + $0x20] ss:$0 sm:$0xff] }
0x153f   :  { %v3604_v0 = vpop.eup %3603  ;;  %3357 = vmatpush3.msra.mxu1 %v2381_v9  ;;  %3358 = vmatprep.mubr.msk.f32.mxu1 %vm3671_vm3, %v3670_v11  ;;  %v1556_v9 = vld [vmem:[#allocation2 + $0x138] sm:$0xff] }
0x1540   :  { %v2379_v8 = vmul.f32 %v3604_v0, %v3600_v37  ;;  %3509 = vmatprep.subr.bf16.mxu1 %v3677_v27  ;;  %v1557_v0 = vld [vmem:[#allocation2 + $0x140] sm:$0xff] }
0x1542   :  { %3359 = vmatmul.mubr.msk.f32.vlgmr.msra.gmra.mrb[30].mxu1 %vm378_vm5, %v2379_v8  ;;  %v3532_v8 = vpack.c.bf16 %v1557_v0, %v1556_v9 }
0x1543   :  { %3511 = vmatpush3.bf16.msra.mxu1 %v4009_v53  ;;  %3372 = vmatprep.mubr.msk.f32.mxu1 %vm3671_vm3, %v3670_v11 }
0x1569   :  { %v2612_v49 = vpop.xlane.xlu1 %2611 }
0x156a   :  { %v2616_v54 = vmul.f32 0.03125, %v2612_v49 }
0x156c   :  { %v2618_v63 = vsub.f32 %v2608_v40, %v2616_v54 }
0x156e   :  { %v2620_v3 = vmul.f32 %v2618_v63, %v2618_v63 }
0x1570   :  { %v2622_v4 = vsel %vm144_vm2, %v2620_v3, 0.0 }
0x1611   :  { %v2285_v45 = vpop.f32.mrb[28].mxu1 }
0x1612   :  { %v3350_v46 = vpop.f32.mrb[29].mxu1  ;;  %3373 = vmatmul.mubr.msk.f32.vlgmr.msra.gmra.mrb[32].mxu1 %vm297_vm4, %v2285_v45 }
0x1615   :  { %v2452_v47 = vpop.f32.mrb[30].mxu1 }
0x1616   :  { %v3360_v48 = vpop.f32.mrb[31].mxu1  ;;  %3366 = vmatmul.mubr.msk.f32.vlgmr.msra.gmra.mrb[22].mxu0 %vm297_vm4, %v2452_v47 }
0x1617   :  { %3515 = vmatpush3.bf16.msra.mxu0 %v3512_v31 }
0x16e5   :  { %v2598_v50 = vpop.f32.mrb[32].mxu1 }
0x16e6   :  { %v3374_v51 = vpop.f32.mrb[33].mxu1 }
0x16e9   :  { %v2525_v57 = vpop.f32.mrb[22].mxu0 }
0x16ea   :  { %v2599_v58 = vadd.f32 %v2598_v50, %v2525_v57  ;;  %v3367_v61 = vpop.f32.mrb[23].mxu0 }
0x16ec   :  { %v2607_v53 = vadd.f32 %v2605_v59, %v2599_v58  ;;  %v1550_v59 = vld [vmem:[#allocation2 + $0x108] sm:$0xff] }
0x16ed   :  { %v3520_v40 = vpack.c.bf16 %v1551_v24, %v1550_v59 }
0x16ee   :  { %v2609_v1 = vadd.f32 %v2607_v53, %v3965_v5  ;;  %v2639_v5 = vrot.slane %v3971_v6, %v1298_v13  ;;  %v3516_v13 = vpack.c.bf16 %v1549_v33, %v1548_v32 }
0x16ef   :  { %3521 = vmatprep.subr.bf16.mxu1 %v3520_v40 }
0x16f0   :  { %v2613_v2 = vsel %vm144_vm2, %v2609_v1, 0.0  ;;  %3517 = vmatprep.subr.bf16.mxu0 %v3516_v13  ;;  %3523 = vmatpush3.bf16.msra.mxu1 %v3520_v40 }
0x16f1   :  { %2614 = vadd.xlane.f32.xlu0 %v2613_v2  ;;  %3519 = vmatpush3.bf16.msra.mxu0 %v3516_v13 }
0x16f2   :  { %3536 = vmatprep.subr.bf16.mxu0 %v3677_v27  ;;  %3525 = vmatprep.subr.bf16.mxu1 %v3524_v20 }
0x16f4   :  { %3527 = vmatpush3.bf16.msra.mxu1 %v3524_v20 }
0x16f5   :  { %2623 = vadd.xlane.f32.xlu0 %v2622_v4  ;;  %3529 = vmatprep.subr.bf16.mxu1 %v3528_v44 }
0x16f8   :  { %3531 = vmatpush3.bf16.msra.mxu1 %v3528_v44 }
0x16f9   :  { %3533 = vmatprep.subr.bf16.mxu1 %v3532_v8 }
0x16fc   :  { %3535 = vmatpush3.bf16.msra.mxu1 %v3532_v8 }
0x177e   :  { %v2615_v12 = vpop.xlane.xlu0 %2614 }
0x177f   :  { %v2617_v7 = vmul.f32 0.03125, %v2615_v12 }
0x1781   :  { %v2619_v16 = vsub.f32 %v2609_v1, %v2617_v7 }
0x1782   :  { %v2624_v17 = vpop.xlane.xlu0 %2623 }
0x1783   :  { %v2628_v18 = vmul.f32 0.03125, %v2624_v17  ;;  %v2621_v10 = vmul.f32 %v2619_v16, %v2619_v16 }
0x1785   :  { %v2630_v62 = vadd.f32 1e-12, %v2628_v18  ;;  %v2625_v19 = vsel %vm144_vm2, %v2621_v10, 0.0  ;;  %v2754_v18 = vrot.slane %v3971_v6, %v1413_v22 }
0x1786   :  { %2626 = vadd.xlane.f32.xlu1 %v2625_v19 }
0x1787   :  { %3605 = vrsqrt.f32 %v2630_v62 }
0x1791   :  { %v3606_v21 = vpop.eup %3605 }
0x1792   :  { %v2634_v23 = vmul.f32 %v3606_v21, %v2618_v63 }
0x1794   :  { %v2640_v26 = vmul.f32 %v2639_v5, %v2634_v23 }
0x1796   :  { %v4069_v28 = vadd.f32 %v2645_v25, %v2640_v26 }
0x1798   :  { %3383 = vmatprep.mubr.msk.f32.mxu0 %vm144_vm2, %v4069_v28 }
0x1813   :  { %v2627_v15 = vpop.xlane.xlu1 %2626 }
0x1814   :  { %v2629_v14 = vmul.f32 0.03125, %v2627_v15 }
0x1816   :  { %v2631_v34 = vadd.f32 1e-12, %v2629_v14 }
0x1818   :  { %3607 = vrsqrt.f32 %v2631_v34 }
0x1822   :  { %v3608_v35 = vpop.eup %3607 }
0x1823   :  { %v2635_v36 = vmul.f32 %v3608_v35, %v2619_v16  ;;  %v2877_v35 = vld [vmem:[%s4129_s4 + $0x8] sm:$0xff] }
0x1825   :  { %v2641_v37 = vmul.f32 %v2639_v5, %v2635_v36 }
0x1827   :  { %v2647_v38 = vadd.f32 %v2645_v25, %v2641_v37  ;;  %v2878_v37 = vld [vmem:[%s4129_s4 + $0x10] sm:$0xff] }
0x1829   :  { %3384 = vmatmul.mubr.msk.f32.vlgmr.msra.gmra.mrb[24].mxu0 %vm144_vm2, %v2647_v38 }
0x182a   :  { %3413 = vmatprep.mubr.msk.f32.mxu0 %vm3671_vm3, %v3670_v11  ;;  %v2651_v11 = vrot.slane %v3971_v6, %v1310_v52 }
0x18fc   :  { %v3385_v45 = vpop.f32.mrb[24].mxu0 }
0x18fd   :  { %v2730_v46 = vadd.f32 %v3385_v45, %v2651_v11  ;;  %v2724_v47 = vpop.f32.mrb[25].mxu0 }
0x18fe   :  { %v2725_v48 = vadd.f32 %v2724_v47, %v2651_v11 }
0x18ff   :  { %v2736_v49 = vmul.f32 0.044715, %v2730_v46  ;;  %v2734_v7 = vmul.f32 0.5, %v2730_v46 }
0x1900   :  { %v2735_v50 = vmul.f32 0.044715, %v2725_v48  ;;  %v2733_v52 = vmul.f32 0.5, %v2725_v48 }
0x1901   :  { %v2738_v51 = vmul.f32 %v2736_v49, %v2730_v46 }
0x1902   :  { %v2737_v54 = vmul.f32 %v2735_v50, %v2725_v48 }
0x1903   :  { %v2740_v57 = vmul.f32 %v2738_v51, %v2730_v46 }
0x1904   :  { %v2739_v58 = vmul.f32 %v2737_v54, %v2725_v48 }
0x1905   :  { %v2742_v61 = vadd.f32 %v2740_v57, %v2730_v46 }
0x1906   :  { %v2741_v63 = vadd.f32 %v2739_v58, %v2725_v48 }
0x1907   :  { %v2744_v53 = vmul.f32 0.7978846, %v2742_v61 }
0x1908   :  { %v2743_v1 = vmul.f32 0.7978846, %v2741_v63 }
0x1909   :  { %3609 = vtanh.f32 %v2744_v53 }
0x190a   :  { %3611 = vtanh.f32 %v2743_v1 }
0x1913   :  { %v3610_v2 = vpop.eup %3609 }
0x1914   :  { %v3612_v3 = vpop.eup %3611  ;;  %v2748_v4 = vadd.f32 1.0, %v3610_v2 }
0x1915   :  { %v2747_v12 = vadd.f32 1.0, %v3612_v3 }
0x1916   :  { %v2750_v17 = vmul.f32 %v2748_v4, %v2734_v7 }
0x1917   :  { %v2749_v16 = vmul.f32 %v2747_v12, %v2733_v52 }
0x1919   :  { %3402 = vmatprep.mubr.msk.f32.mxu1 %vm1415_vm6, %v2749_v16 }
0x191a   :  { %3403 = vmatmul.mubr.msk.f32.vlgmr.msra.gmra.mrb[34].mxu1 %vm1415_vm6, %v2750_v17 }
0x19ed   :  { %v3404_v10 = vpop.f32.mrb[34].mxu1 }
0x19ee   :  { %v2833_v62 = vadd.f32 %v3404_v10, %v2754_v18  ;;  %v2827_v19 = vpop.f32.mrb[35].mxu1 }
0x19ef   :  { %v2828_v5 = vadd.f32 %v2827_v19, %v2754_v18 }
0x19f0   :  { %v2837_v21 = vadd.f32 %v2833_v62, %v2647_v38  ;;  %v2879_v38 = vld [vmem:[%s4129_s4 + $0x18] sm:$0xff] }
0x19f1   :  { %v2836_v23 = vadd.f32 %v2828_v5, %v4069_v28  ;;  %v2876_v28 = vld [vmem:[%s4129_s4] sm:$0xff]  ;;  %v3540_v59 = vpack.c.bf16 %v2879_v38, %v2878_v37 }
0x19f2   :  { %v2841_v25 = vsel %vm144_vm2, %v2837_v21, 0.0  ;;  %v3537_v36 = vpack.c.bf16 %v2877_v35, %v2876_v28 }
0x19f3   :  { %2842 = vadd.xlane.f32.xlu0 %v2841_v25  ;;  %v2838_v26 = vsel %vm144_vm2, %v2836_v23, 0.0 }
0x19f4   :  { %2839 = vadd.xlane.f32.xlu1 %v2838_v26  ;;  %3538 = vmatpush3.bf16.msra.mxu0 %v3537_v36 }
0x19f5   :  { %3539 = vmatprep.subr.bf16.mxu0 %v3677_v27  ;;  %v2873_v27 = vrot.slane %v3971_v6, %v1533_v56 }
0x19f8   :  { %3541 = vmatpush3.bf16.msra.mxu0 %v3540_v59 }
0x1a80   :  { %v2843_v29 = vpop.xlane.xlu0 %2842 }
0x1a81   :  { %v2845_v30 = vmul.f32 0.03125, %v2843_v29  ;;  %v2840_v31 = vpop.xlane.xlu1 %2839 }
0x1a82   :  { %v2844_v32 = vmul.f32 0.03125, %v2840_v31 }
0x1a83   :  { %v2847_v33 = vsub.f32 %v2837_v21, %v2845_v30 }
0x1a84   :  { %v2846_v13 = vsub.f32 %v2836_v23, %v2844_v32 }
0x1a85   :  { %v2849_v22 = vmul.f32 %v2847_v33, %v2847_v33 }
0x1a86   :  { %v2848_v15 = vmul.f32 %v2846_v13, %v2846_v13 }
0x1a87   :  { %v2853_v14 = vsel %vm144_vm2, %v2849_v22, 0.0 }
0x1a88   :  { %2854 = vadd.xlane.f32.xlu0 %v2853_v14  ;;  %v2850_v34 = vsel %vm144_vm2, %v2848_v15, 0.0 }
0x1a89   :  { %2851 = vadd.xlane.f32.xlu1 %v2850_v34 }
0x1b15   :  { %v2855_v24 = vpop.xlane.xlu0 %2854 }
0x1b16   :  { %v2857_v40 = vmul.f32 0.03125, %v2855_v24  ;;  %v2852_v41 = vpop.xlane.xlu1 %2851 }
0x1b17   :  { %v2856_v42 = vmul.f32 0.03125, %v2852_v41 }
0x1b18   :  { %v2859_v20 = vadd.f32 1e-12, %v2857_v40 }
0x1b19   :  { %v2858_v43 = vadd.f32 1e-12, %v2856_v42 }
0x1b1a   :  { %3613 = vrsqrt.f32 %v2859_v20 }
0x1b1b   :  { %3615 = vrsqrt.f32 %v2858_v43 }
0x1b24   :  { %v3614_v44 = vpop.eup %3613 }
0x1b25   :  { %v3616_v9 = vpop.eup %3615  ;;  %v2863_v0 = vmul.f32 %v3614_v44, %v2847_v33 }
0x1b26   :  { %v2862_v8 = vmul.f32 %v3616_v9, %v2846_v13 }
0x1b27   :  { %v2869_v11 = vmul.f32 %v2867_v39, %v2863_v0 }
0x1b28   :  { %v2868_v45 = vmul.f32 %v2867_v39, %v2862_v8 }
0x1b29   :  { %v2875_v46 = vadd.f32 %v2873_v27, %v2869_v11 }
0x1b2a   :  { %v2874_v47 = vadd.f32 %v2873_v27, %v2868_v45 }
0x1b2b   :  { %v2882_v48 = vrot.slane %v2875_v46, 7 }
0x1b2d   :  { %v2885_v49 = vsel %vm2884_vm7, %v2874_v47, %v2882_v48 }
0x1b2e   :  { %3414 = vmatmul.mubr.msk.f32.vlgmr.msra.gmra.mrb[26].mxu0 %vm144_vm2, %v2885_v49 }
0x1c01   :  { %v2959_v50 = vpop.f32.mrb[26].mxu0 }
0x1c02   :  { %v2960_v60 = vadd.f32 %v3027_v55, %v2959_v50  ;;  %v3415_v51 = vpop.f32.mrb[27].mxu0 }
0x1c04   :  { %2963 = vst [vmem:[#allocation5] sm:$0x3] %v2960_v60 }
0x1c05   :  { %3650 = shalt.err (!%p3647_p12)
}
0x1c06   :  { %s3651_s13 = scalar_lea.hbm %s4130_s5, 32 }
0x1c07   :  { %p3652_p13 = scmp.ne.s32.totalorder %s4130_s5, %s3651_s13  ;;  %p3655_p0 = scmp.lt.u32.totalorder %s3651_s13, %s4130_s5 }
0x1c09   :  { %p3657_p1 = pnand %p3655_p0, %p3652_p13 }
0x1c0b   :  { %3660 = shalt.err (!%p3657_p1)
}
0x1c0c   :  { %2973 = dma.vmem_to_hbm [thread:$0]  %s2971_s9, 32, %s4130_s5, [#allocation4]  }
0x1c0d   :  { %3663 = dma.done.wait [#allocation4], 32  }
0x1c0e   :  { %3664 = vsyncadd [#allocation4], 4294967264 }
0x1c0f   :  { %2977 = vsyncpa [#allocation3], 1 }
0x1c10   :  { %2978 = vsyncpa [#allocation4], 1 }

</bundles_post_ra>
